<compile_context>
chip_gen: v5e
topology: v5e:2x2
jax: 0.10.0
libtpu: 0.0.40
codegen_flags: <defaults>
</compile_context>

<pallas_src>
import functools
from typing import NamedTuple

import numpy as np
import jax
import jax.numpy as jnp
from jax.experimental import pallas as pl
from jax.experimental.pallas import tpu as pltpu

F32 = jnp.float32
BF16 = jnp.bfloat16
LANE = 128      # vreg lane width
SUB = 8         # f32 sublane width
SUB_BF16 = 16   # bf16 sublane tile height


class Dims(NamedTuple):
    n: int
    npad: int
    chw_pad: int
    bdpad: int
    fpad: int
    hpad: int
    opad: int
    hidden: int
    out_dim: int


def _round_up(x, m):
    return (x + m - 1) // m * m


def _act(x, relu_type):
    if relu_type == 'relu':
        return jnp.maximum(x, 0.0)
    # F.leaky_relu default negative_slope = 0.01
    return jnp.where(x >= 0, x, 0.01 * x)


# ----------------------------- fused Pallas kernel ---------------------------------

def gnn_fused_kernel(
        x_in_ref, a_add_ref, a_mean_ref,
        wconv_ref, wcomb_ref, wsage_ref, wpost_ref, bias_ref,
        emb_ref, out_ref,
        *, relu_type, hidden, out_dim, chw_pad, fpad, hpad, opad):
    # bf16 matmul inputs, f32 accumulation (MXU native path); everything else f32.
    def dot(a, b):
        return jnp.dot(a.astype(BF16), b.astype(BF16), preferred_element_type=F32)

    bias = bias_ref[...]                       # one small f32 slab holds every (1, X) vector
    bconv = bias[0:1, :fpad]
    bcomb = bias[1:2, :2 * hpad]
    bl = [bias[2 + 3 * i: 3 + 3 * i, :hpad] for i in range(3)]   # rows 2, 5, 8
    gm = [bias[3 + 3 * i: 4 + 3 * i, :hpad] for i in range(2)]   # rows 3, 6
    bt = [bias[4 + 3 * i: 5 + 3 * i, :hpad] for i in range(2)]   # rows 4, 7
    bpost = bias[9:10, :opad]

    x_in = x_in_ref[...]                       # (npad, chw_pad + bdpad), [x_flat | bd]
    x_flat = x_in[:, :chw_pad]
    bd = x_in[:, chw_pad:]

    # ---- layer 0: CustomConv (conv -> flatten -> hstack(bd) -> act -> lin/lin_self -> add-agg)
    conv = dot(x_flat, wconv_ref[...]) + bconv
    feat = jnp.concatenate([_act(conv, relu_type), _act(bd, relu_type)], axis=-1)
    # single matmul: rows = [conv-feat ; bd-feat], cols = [lin_self | lin]
    comb = dot(feat, wcomb_ref[...]) + bcomb
    self_x = comb[:, :hpad]
    x_nb = comb[:, hpad:]
    x = self_x + dot(a_add_ref[...], x_nb)     # add-aggregation (self-loops removed)

    a_mean = a_mean_ref[...]                   # loaded once, reused by all 3 SAGE layers
    inv_h = 1.0 / hidden

    def layer_norm(y, g, b):
        # padded lanes of y are exactly 0, so the sums see only the real hidden dims
        mean = jnp.sum(y, axis=-1, keepdims=True) * inv_h
        var = jnp.sum(y * y, axis=-1, keepdims=True) * inv_h - mean * mean
        # gamma/beta are zero on padded lanes -> padded lanes stay exactly 0 for the next layer
        return (y - mean) * jax.lax.rsqrt(var + 1e-5) * g + b

    # TODO(synk): F.dropout / nn.Dropout(p=0.25) not ported; identity (eval semantics).
    for i in range(3):
        agg = dot(a_mean, x)                              # mean-aggregated neighbors
        xcat = jnp.concatenate([agg, x], axis=-1)         # (npad, 2*hpad): K=256 fills the MXU
        h = dot(xcat, wsage_ref[i]) + bl[i]               # [wl; wr] stacked on the K axis
        y = _act(h, relu_type)
        if i < 2:                                         # LayerNorm only after SAGE layers 1, 2
            x = layer_norm(y, gm[i], bt[i])
        else:
            emb_ref[...] = h                              # only the last layer's emb is consumed
            x = y

    # ---- post_mp folded: single matmul with wp1@wp2 / bp1@wp2+bp2 precomputed host-side ----
    logits = dot(x, wpost_ref[...]) + bpost
    omask = jax.lax.broadcasted_iota(jnp.int32, (1, opad), 1) < out_dim
    logits = jnp.where(omask, logits, -1e30)              # exclude zero-padded lanes
    m = jnp.max(logits, axis=-1, keepdims=True)
    lse = m + jnp.log(jnp.sum(jnp.exp(logits - m), axis=-1, keepdims=True))
    out_ref[...] = logits - lse


# --------------------------------- wrapper ------------------------------------------

@functools.partial(jax.jit, static_argnames=('relu_type', 'dims'))
def gnn_stack_forward(x, bd, a_add_p, a_mean_p, wpad, relu_type, dims):
    d = dims
    x_flat = x.reshape(d.n, -1)
    x_in = jnp.concatenate([
        jnp.pad(x_flat.astype(F32), ((0, d.npad - d.n), (0, d.chw_pad - x_flat.shape[1]))),
        jnp.pad(bd.astype(F32), ((0, d.npad - d.n), (0, d.bdpad - bd.shape[1]))),
    ], axis=1)

    operands = (x_in, a_add_p, a_mean_p,
                wpad['wconv'], wpad['wcomb'], wpad['wsage'], wpad['wpost'], wpad['bias'])

    flops = 2 * d.npad * (d.chw_pad * d.fpad
                          + (d.fpad + d.bdpad) * 2 * d.hpad
                          + d.npad * d.hpad
                          + 3 * (d.npad * d.hpad + 2 * d.hpad * d.hpad)
                          + d.hpad * d.opad)
    bytes_accessed = (sum(int(np.prod(o.shape)) * o.dtype.itemsize for o in operands)
                      + 4 * d.npad * (d.hpad + d.opad))

    vmem = pl.BlockSpec(memory_space=pltpu.MemorySpace.VMEM)
    kern = functools.partial(gnn_fused_kernel, relu_type=relu_type,
                             hidden=d.hidden, out_dim=d.out_dim,
                             chw_pad=d.chw_pad, fpad=d.fpad, hpad=d.hpad, opad=d.opad)
    emb_p, out_p = pl.pallas_call(
        kern,
        out_shape=(jax.ShapeDtypeStruct((d.npad, d.hpad), F32),
                   jax.ShapeDtypeStruct((d.npad, d.opad), F32)),
        in_specs=[vmem] * len(operands),
        out_specs=(vmem, vmem),
        # actual footprint is <2 MiB; 16 MiB leaves headroom on every generation (v7x: 64 MiB).
        compiler_params=pltpu.CompilerParams(vmem_limit_bytes=16 * 1024 * 1024),
        cost_estimate=pl.CostEstimate(flops=int(flops),
                                      transcendentals=int(d.npad * (d.opad + 8)),
                                      bytes_accessed=int(bytes_accessed)),
    )(*operands)
    return emb_p[:d.n, :d.hidden], out_p[:d.n, :d.out_dim]


# --------------------------- parameter setup --------------------------------

def conv3x3_valid_as_gemm(w, b, c, h, wd):
    """Unfold a (C,C,3,3) VALID conv into (C*H*W, C*Ho*Wo) so that
    x.reshape(N, C*H*W) @ Wmat == torch.flatten(conv(x), start_dim=1)."""
    ho, wo = h - 2, wd - 2
    w = np.asarray(w, dtype=np.float32)
    wm = np.zeros((c * h * wd, c * ho * wo), dtype=np.float32)
    for co in range(c):
        for ci in range(c):
            for kh in range(3):
                for kw in range(3):
                    for i in range(ho):
                        for j in range(wo):
                            wm[ci * h * wd + (i + kh) * wd + (j + kw),
                               co * ho * wo + i * wo + j] += w[co, ci, kh, kw]
    bm = np.repeat(np.asarray(b, dtype=np.float32), ho * wo)[None, :]
    return wm, bm


def init_params(key, c, h, wd, bd_dim, hidden, out_dim):
    ho, wo = h - 2, wd - 2
    f_conv = c * ho * wo
    ks = jax.random.split(key, 32)
    s = 0.1

    def rn(k, shape):
        return (s * jax.random.normal(k, shape)).astype(F32)

    p = dict(
        conv_w=rn(ks[0], (c, c, 3, 3)),          # Conv2d(in_ch, in_ch, 3, 3) weight
        conv_b=rn(ks[1], (c,)),                  # Conv2d bias
        wsa=rn(ks[2], (f_conv, hidden)),         # lin_self weight (conv part)
        wsb=rn(ks[3], (bd_dim, hidden)),         # lin_self weight (bd_pred part)
        bs=rn(ks[4], (1, hidden)),
        wna=rn(ks[5], (f_conv, hidden)),         # lin weight (conv part)
        wnb=rn(ks[6], (bd_dim, hidden)),         # lin weight (bd_pred part)
        bn=rn(ks[7], (1, hidden)),
        wp1=rn(ks[8], (hidden, hidden)),         # post_mp Linear 1
        bp1=rn(ks[9], (1, hidden)),
        wp2=rn(ks[10], (hidden, out_dim)),       # post_mp Linear 2
        bp2=rn(ks[11], (1, out_dim)),
    )
    sage = []
    idx = 12
    for _ in range(3):                            # SAGEConv layers 1..3 + LayerNorms (1,2)
        sage.append(dict(
            wl=rn(ks[idx + 0], (hidden, hidden)),         # lin_l (bias=True)
            bl=rn(ks[idx + 1], (1, hidden)),
            wr=rn(ks[idx + 2], (hidden, hidden)),         # lin_r (bias=False)
            gamma=(1.0 + rn(ks[idx + 3], (1, hidden))).astype(F32),
            beta=rn(ks[idx + 4], (1, hidden)),
        ))
        idx += 5
    p['sage'] = sage
    return p


def pack_padded_params(p, n, c, h, wd, bd_dim, hidden, out_dim):
    """Zero-pad / fuse all kernel operands once, host-side.  bf16 for matmul weights,
    f32 for the bias slab (added post-accumulation)."""
    ho, wo = h - 2, wd - 2
    f_conv = c * ho * wo
    chw = c * h * wd
    chw_pad = _round_up(chw, LANE)
    fpad = _round_up(f_conv, LANE)
    bdpad = _round_up(bd_dim, LANE)
    hpad = _round_up(hidden, LANE)
    opad = _round_up(out_dim, LANE)
    npad = _round_up(n, SUB_BF16)            # NO 128-row floor: MXU streams any row count

    def pad2(a, rows, cols):
        out = np.zeros((rows, cols), np.float32)
        a = np.asarray(a, np.float32)
        out[:a.shape[0], :a.shape[1]] = a
        return out

    wm, bm = conv3x3_valid_as_gemm(p['conv_w'], p['conv_b'], c, h, wd)
    # TODO(synk): for large C*H*W replace this (mostly-zero) Toeplitz GEMM with an im2col GEMM.
    wconv = jnp.asarray(pad2(wm, chw_pad, fpad), BF16)

    # CustomConv: rows = [conv-features ; bd-features], cols = [lin_self | lin]
    wcomb = np.zeros((fpad + bdpad, 2 * hpad), np.float32)
    wcomb[:f_conv, :hidden] = np.asarray(p['wsa'], np.float32)
    wcomb[:f_conv, hpad:hpad + hidden] = np.asarray(p['wna'], np.float32)
    wcomb[fpad:fpad + bd_dim, :hidden] = np.asarray(p['wsb'], np.float32)
    wcomb[fpad:fpad + bd_dim, hpad:hpad + hidden] = np.asarray(p['wnb'], np.float32)

    # SAGE: per layer [wl ; wr] stacked on the K axis -> single K=2*hpad matmul in-kernel
    wsage = np.zeros((3, 2 * hpad, hpad), np.float32)
    for i, lp in enumerate(p['sage']):
        wsage[i, :hidden, :hidden] = np.asarray(lp['wl'], np.float32)
        wsage[i, hpad:hpad + hidden, :hidden] = np.asarray(lp['wr'], np.float32)

    # post_mp fold: no nonlinearity between the two Linears (dropout=identity at eval)
    wp = np.asarray(p['wp1'], np.float32) @ np.asarray(p['wp2'], np.float32)
    bp = np.asarray(p['bp1'], np.float32) @ np.asarray(p['wp2'], np.float32) \
        + np.asarray(p['bp2'], np.float32)

    # one f32 slab for every small (1, X) vector
    bw = max(fpad, 2 * hpad, opad)
    bias = np.zeros((_round_up(10, SUB), bw), np.float32)
    bias[0, :f_conv] = bm[0]                               # conv bias (flattened)
    bias[1, :hidden] = np.asarray(p['bs'], np.float32)[0]  # lin_self bias
    bias[1, hpad:hpad + hidden] = np.asarray(p['bn'], np.float32)[0]   # lin bias
    for i, lp in enumerate(p['sage']):
        bias[2 + 3 * i, :hidden] = np.asarray(lp['bl'], np.float32)[0]
        if i < 2:
            bias[3 + 3 * i, :hidden] = np.asarray(lp['gamma'], np.float32)[0]
            bias[4 + 3 * i, :hidden] = np.asarray(lp['beta'], np.float32)[0]
    bias[9, :out_dim] = bp[0]

    wpad = dict(wconv=wconv,
                wcomb=jnp.asarray(wcomb, BF16),
                wsage=jnp.asarray(wsage, BF16),
                wpost=jnp.asarray(pad2(wp, hpad, opad), BF16),
                bias=jnp.asarray(bias))
    dims = Dims(n=n, npad=npad, chw_pad=chw_pad, bdpad=bdpad, fpad=fpad,
                hpad=hpad, opad=opad, hidden=hidden, out_dim=out_dim)
    return wpad, dims


# ---------------------------- pure-JAX reference ----------------------------

def reference_forward(x, bd, a_add, a_mean, p, relu_type):
    n = x.shape[0]
    conv = jax.lax.conv_general_dilated(
        x, p['conv_w'], window_strides=(1, 1), padding='VALID',
        dimension_numbers=('NCHW', 'OIHW', 'NCHW')) + p['conv_b'][None, :, None, None]
    flat = conv.reshape(n, -1)
    feat = jnp.concatenate([flat, bd], axis=1)
    a = _act(feat, relu_type)
    w_self = jnp.concatenate([p['wsa'], p['wsb']], axis=0)
    w_nb = jnp.concatenate([p['wna'], p['wnb']], axis=0)
    self_x = a @ w_self + p['bs']
    x_nb = a @ w_nb + p['bn']
    xcur = self_x + a_add @ x_nb
    emb = xcur
    for i in range(1, 4):
        lp = p['sage'][i - 1]
        h = (a_mean @ xcur) @ lp['wl'] + lp['bl'] + xcur @ lp['wr']
        emb = h
        y = _act(h, relu_type)
        if i != 3:
            mean = y.mean(-1, keepdims=True)
            var = ((y - mean) ** 2).mean(-1, keepdims=True)
            y = (y - mean) / jnp.sqrt(var + 1e-5) * lp['gamma'] + lp['beta']
        xcur = y
    hmp = xcur @ p['wp1'] + p['bp1']
    logits = hmp @ p['wp2'] + p['bp2']
    return emb, jax.nn.log_softmax(logits, axis=1)


# --------------------------------- main --------------------------------------

if __name__ == "__main__":
    N, C, H, W = 16, 4, 8, 8
    BD_DIM, HIDDEN, OUT_DIM = 16, 32, 4
    E = 40
    RELU_TYPE = 'relu'          # module's relu_type ('relu' or anything else -> leaky_relu)

    key = jax.random.PRNGKey(0)
    k_x, k_bd, k_src, k_dst, k_p = jax.random.split(key, 5)
    x = jax.random.normal(k_x, (N, C, H, W), dtype=F32)          # data.x (node images, NCHW)
    bd = jax.random.normal(k_bd, (N, BD_DIM), dtype=F32)         # data.bd_pred
    src = np.asarray(jax.random.randint(k_src, (E,), 0, N))
    dst = np.asarray(jax.random.randint(k_dst, (E,), 0, N))
    edge_index = np.stack([src, dst]).astype(np.int32)           # data.edge_index (2, E)

    # Dense adjacency matrices (glue, built once from edge_index):
    #   A_add  : add-aggregation, self-loops removed  (CustomConv.propagate, aggr='add')
    #   A_mean : mean-aggregation over incoming edges (SAGEConv default aggr)
    mask = edge_index[0] != edge_index[1]
    ei_nsl = edge_index[:, mask]
    A_add = np.zeros((N, N), np.float32)
    np.add.at(A_add, (ei_nsl[1], ei_nsl[0]), 1.0)
    A_sage = np.zeros((N, N), np.float32)
    np.add.at(A_sage, (edge_index[1], edge_index[0]), 1.0)
    deg = A_sage.sum(axis=1, keepdims=True)
    A_mean = A_sage / np.where(deg == 0, 1.0, deg)

    params = init_params(k_p, C, H, W, BD_DIM, HIDDEN, OUT_DIM)
    wpad, dims = pack_padded_params(params, N, C, H, W, BD_DIM, HIDDEN, OUT_DIM)

    # graph-static adjacencies padded ONCE (not per forward call)
    padn = dims.npad - N
    a_add_p = jnp.asarray(np.pad(A_add, ((0, padn), (0, padn))))
    a_mean_p = jnp.asarray(np.pad(A_mean, ((0, padn), (0, padn))))

    emb, logprobs = gnn_stack_forward(x, bd, a_add_p, a_mean_p, wpad,
                                      relu_type=RELU_TYPE, dims=dims)
    emb = jax.block_until_ready(emb)
    logprobs = jax.block_until_ready(logprobs)

    emb_ref, lp_ref = reference_forward(x, bd, jnp.asarray(A_add), jnp.asarray(A_mean),
                                        params, RELU_TYPE)
    # tolerance slightly relaxed vs f32-vs-f32: the kernel runs its matmuls on the bf16 MXU path
    np.testing.assert_allclose(np.asarray(emb), np.asarray(emb_ref), rtol=5e-2, atol=5e-2)
    np.testing.assert_allclose(np.asarray(logprobs), np.asarray(lp_ref), rtol=5e-2, atol=5e-2)

    print("KERNEL_OK")
</pallas_src>

<mosaic_0001>
module attributes {stable_mosaic.version = 11 : i64} {
  func.func @gnn_fused_kernel(%arg0: memref<16x384xf32, #tpu.memory_space<vmem>>, %arg1: memref<16x16xf32, #tpu.memory_space<vmem>>, %arg2: memref<16x16xf32, #tpu.memory_space<vmem>>, %arg3: memref<256x256xbf16, #tpu.memory_space<vmem>>, %arg4: memref<384x256xbf16, #tpu.memory_space<vmem>>, %arg5: memref<3x256x128xbf16, #tpu.memory_space<vmem>>, %arg6: memref<128x128xbf16, #tpu.memory_space<vmem>>, %arg7: memref<16x256xf32, #tpu.memory_space<vmem>>, %arg8: memref<16x128xf32, #tpu.memory_space<vmem>>, %arg9: memref<16x128xf32, #tpu.memory_space<vmem>>) attributes {dimension_semantics = [], scalar_prefetch = 0 : i64, scratch_operands = 0 : i64, tpu.core_type = #tpu.core_type<tc>} {
    %c0 = arith.constant 0 : index
    %c0_0 = arith.constant 0 : index
    %0 = vector.load %arg7[%c0, %c0_0] : memref<16x256xf32, #tpu.memory_space<vmem>>, vector<16x256xf32>
    %1 = vector.extract_strided_slice %0 {offsets = [0, 0], sizes = [1, 256], strides = [1, 1]} : vector<16x256xf32> to vector<1x256xf32>
    %2 = vector.extract_strided_slice %0 {offsets = [1, 0], sizes = [1, 256], strides = [1, 1]} : vector<16x256xf32> to vector<1x256xf32>
    %3 = vector.extract_strided_slice %0 {offsets = [2, 0], sizes = [1, 128], strides = [1, 1]} : vector<16x256xf32> to vector<1x128xf32>
    %4 = vector.extract_strided_slice %0 {offsets = [5, 0], sizes = [1, 128], strides = [1, 1]} : vector<16x256xf32> to vector<1x128xf32>
    %5 = vector.extract_strided_slice %0 {offsets = [8, 0], sizes = [1, 128], strides = [1, 1]} : vector<16x256xf32> to vector<1x128xf32>
    %6 = vector.extract_strided_slice %0 {offsets = [3, 0], sizes = [1, 128], strides = [1, 1]} : vector<16x256xf32> to vector<1x128xf32>
    %7 = vector.extract_strided_slice %0 {offsets = [6, 0], sizes = [1, 128], strides = [1, 1]} : vector<16x256xf32> to vector<1x128xf32>
    %8 = vector.extract_strided_slice %0 {offsets = [4, 0], sizes = [1, 128], strides = [1, 1]} : vector<16x256xf32> to vector<1x128xf32>
    %9 = vector.extract_strided_slice %0 {offsets = [7, 0], sizes = [1, 128], strides = [1, 1]} : vector<16x256xf32> to vector<1x128xf32>
    %10 = vector.extract_strided_slice %0 {offsets = [9, 0], sizes = [1, 128], strides = [1, 1]} : vector<16x256xf32> to vector<1x128xf32>
    %c0_1 = arith.constant 0 : index
    %c0_2 = arith.constant 0 : index
    %11 = vector.load %arg0[%c0_1, %c0_2] : memref<16x384xf32, #tpu.memory_space<vmem>>, vector<16x384xf32>
    %12 = vector.extract_strided_slice %11 {offsets = [0, 0], sizes = [16, 256], strides = [1, 1]} : vector<16x384xf32> to vector<16x256xf32>
    %13 = vector.extract_strided_slice %11 {offsets = [0, 256], sizes = [16, 128], strides = [1, 1]} : vector<16x384xf32> to vector<16x128xf32>
    %c0_3 = arith.constant 0 : index
    %c0_4 = arith.constant 0 : index
    %14 = vector.load %arg3[%c0_3, %c0_4] : memref<256x256xbf16, #tpu.memory_space<vmem>>, vector<256x256xbf16>
    %15 = arith.truncf %12 : vector<16x256xf32> to vector<16x256xbf16>
    %cst = arith.constant dense<0.000000e+00> : vector<16x256xf32>
    %16 = tpu.matmul %15, %14, %cst {dimension_numbers = #tpu.dot_dimension_numbers<[1], [0], [0], [1], [0, 0, 1, 1], [], []>} : vector<16x256xbf16>, vector<256x256xbf16>, vector<16x256xf32> -> vector<16x256xf32>
    %17 = vector.broadcast %1 : vector<1x256xf32> to vector<16x256xf32>
    %18 = arith.addf %16, %17 : vector<16x256xf32>
    %cst_5 = arith.constant 0.000000e+00 : f32
    %19 = vector.broadcast %cst_5 : f32 to vector<16x256xf32>
    %20 = arith.maximumf %18, %19 : vector<16x256xf32>
    %cst_6 = arith.constant 0.000000e+00 : f32
    %21 = vector.broadcast %cst_6 : f32 to vector<16x128xf32>
    %22 = arith.maximumf %13, %21 : vector<16x128xf32>
    %23 = tpu.concatenate %20, %22 in 1 : vector<16x256xf32>, vector<16x128xf32> -> vector<16x384xf32>
    %c0_7 = arith.constant 0 : index
    %c0_8 = arith.constant 0 : index
    %24 = vector.load %arg4[%c0_7, %c0_8] : memref<384x256xbf16, #tpu.memory_space<vmem>>, vector<384x256xbf16>
    %25 = arith.truncf %23 : vector<16x384xf32> to vector<16x384xbf16>
    %cst_9 = arith.constant dense<0.000000e+00> : vector<16x256xf32>
    %26 = tpu.matmul %25, %24, %cst_9 {dimension_numbers = #tpu.dot_dimension_numbers<[1], [0], [0], [1], [0, 0, 1, 1], [], []>} : vector<16x384xbf16>, vector<384x256xbf16>, vector<16x256xf32> -> vector<16x256xf32>
    %27 = vector.broadcast %2 : vector<1x256xf32> to vector<16x256xf32>
    %28 = arith.addf %26, %27 : vector<16x256xf32>
    %29 = vector.extract_strided_slice %28 {offsets = [0, 0], sizes = [16, 128], strides = [1, 1]} : vector<16x256xf32> to vector<16x128xf32>
    %30 = vector.extract_strided_slice %28 {offsets = [0, 128], sizes = [16, 128], strides = [1, 1]} : vector<16x256xf32> to vector<16x128xf32>
    %c0_10 = arith.constant 0 : index
    %c0_11 = arith.constant 0 : index
    %31 = vector.load %arg1[%c0_10, %c0_11] : memref<16x16xf32, #tpu.memory_space<vmem>>, vector<16x16xf32>
    %32 = arith.truncf %31 : vector<16x16xf32> to vector<16x16xbf16>
    %33 = arith.truncf %30 : vector<16x128xf32> to vector<16x128xbf16>
    %cst_12 = arith.constant dense<0.000000e+00> : vector<16x128xf32>
    %34 = tpu.matmul %32, %33, %cst_12 {dimension_numbers = #tpu.dot_dimension_numbers<[1], [0], [0], [1], [0, 0, 1, 1], [], []>} : vector<16x16xbf16>, vector<16x128xbf16>, vector<16x128xf32> -> vector<16x128xf32>
    %35 = arith.addf %29, %34 : vector<16x128xf32>
    %c0_13 = arith.constant 0 : index
    %c0_14 = arith.constant 0 : index
    %36 = vector.load %arg2[%c0_13, %c0_14] : memref<16x16xf32, #tpu.memory_space<vmem>>, vector<16x16xf32>
    %37 = arith.truncf %36 : vector<16x16xf32> to vector<16x16xbf16>
    %38 = arith.truncf %35 : vector<16x128xf32> to vector<16x128xbf16>
    %cst_15 = arith.constant dense<0.000000e+00> : vector<16x128xf32>
    %39 = tpu.matmul %37, %38, %cst_15 {dimension_numbers = #tpu.dot_dimension_numbers<[1], [0], [0], [1], [0, 0, 1, 1], [], []>} : vector<16x16xbf16>, vector<16x128xbf16>, vector<16x128xf32> -> vector<16x128xf32>
    %40 = tpu.concatenate %39, %35 in 1 : vector<16x128xf32>, vector<16x128xf32> -> vector<16x256xf32>
    %c0_16 = arith.constant 0 : index
    %c0_17 = arith.constant 0 : index
    %c0_18 = arith.constant 0 : index
    %41 = vector.load %arg5[%c0_16, %c0_17, %c0_18] : memref<3x256x128xbf16, #tpu.memory_space<vmem>>, vector<1x256x128xbf16>
    %42 = vector.shape_cast %41 : vector<1x256x128xbf16> to vector<256x128xbf16>
    %43 = arith.truncf %40 : vector<16x256xf32> to vector<16x256xbf16>
    %cst_19 = arith.constant dense<0.000000e+00> : vector<16x128xf32>
    %44 = tpu.matmul %43, %42, %cst_19 {dimension_numbers = #tpu.dot_dimension_numbers<[1], [0], [0], [1], [0, 0, 1, 1], [], []>} : vector<16x256xbf16>, vector<256x128xbf16>, vector<16x128xf32> -> vector<16x128xf32>
    %45 = vector.broadcast %3 : vector<1x128xf32> to vector<16x128xf32>
    %46 = arith.addf %44, %45 : vector<16x128xf32>
    %cst_20 = arith.constant 0.000000e+00 : f32
    %47 = vector.broadcast %cst_20 : f32 to vector<16x128xf32>
    %48 = arith.maximumf %46, %47 : vector<16x128xf32>
    %cst_21 = arith.constant dense<0.000000e+00> : vector<16xf32>
    %49 = vector.multi_reduction <add>, %48, %cst_21 [1] : vector<16x128xf32> to vector<16xf32>
    %50 = vector.shape_cast %49 : vector<16xf32> to vector<16x1xf32>
    %cst_22 = arith.constant 3.125000e-02 : f32
    %51 = vector.broadcast %cst_22 : f32 to vector<16x1xf32>
    %52 = arith.mulf %50, %51 : vector<16x1xf32>
    %53 = arith.mulf %48, %48 : vector<16x128xf32>
    %cst_23 = arith.constant dense<0.000000e+00> : vector<16xf32>
    %54 = vector.multi_reduction <add>, %53, %cst_23 [1] : vector<16x128xf32> to vector<16xf32>
    %55 = vector.shape_cast %54 : vector<16xf32> to vector<16x1xf32>
    %cst_24 = arith.constant 3.125000e-02 : f32
    %56 = vector.broadcast %cst_24 : f32 to vector<16x1xf32>
    %57 = arith.mulf %55, %56 : vector<16x1xf32>
    %58 = arith.mulf %52, %52 : vector<16x1xf32>
    %59 = arith.subf %57, %58 : vector<16x1xf32>
    %60 = vector.broadcast %52 : vector<16x1xf32> to vector<16x128xf32>
    %61 = arith.subf %48, %60 : vector<16x128xf32>
    %cst_25 = arith.constant 9.99999974E-6 : f32
    %62 = vector.broadcast %cst_25 : f32 to vector<16x1xf32>
    %63 = arith.addf %59, %62 : vector<16x1xf32>
    %64 = math.rsqrt %63 : vector<16x1xf32>
    %65 = vector.broadcast %64 : vector<16x1xf32> to vector<16x128xf32>
    %66 = arith.mulf %61, %65 : vector<16x128xf32>
    %67 = vector.broadcast %6 : vector<1x128xf32> to vector<16x128xf32>
    %68 = arith.mulf %66, %67 : vector<16x128xf32>
    %69 = vector.broadcast %8 : vector<1x128xf32> to vector<16x128xf32>
    %70 = arith.addf %68, %69 : vector<16x128xf32>
    %71 = arith.truncf %36 : vector<16x16xf32> to vector<16x16xbf16>
    %72 = arith.truncf %70 : vector<16x128xf32> to vector<16x128xbf16>
    %cst_26 = arith.constant dense<0.000000e+00> : vector<16x128xf32>
    %73 = tpu.matmul %71, %72, %cst_26 {dimension_numbers = #tpu.dot_dimension_numbers<[1], [0], [0], [1], [0, 0, 1, 1], [], []>} : vector<16x16xbf16>, vector<16x128xbf16>, vector<16x128xf32> -> vector<16x128xf32>
    %74 = tpu.concatenate %73, %70 in 1 : vector<16x128xf32>, vector<16x128xf32> -> vector<16x256xf32>
    %c1 = arith.constant 1 : index
    %c0_27 = arith.constant 0 : index
    %c0_28 = arith.constant 0 : index
    %75 = vector.load %arg5[%c1, %c0_27, %c0_28] : memref<3x256x128xbf16, #tpu.memory_space<vmem>>, vector<1x256x128xbf16>
    %76 = vector.shape_cast %75 : vector<1x256x128xbf16> to vector<256x128xbf16>
    %77 = arith.truncf %74 : vector<16x256xf32> to vector<16x256xbf16>
    %cst_29 = arith.constant dense<0.000000e+00> : vector<16x128xf32>
    %78 = tpu.matmul %77, %76, %cst_29 {dimension_numbers = #tpu.dot_dimension_numbers<[1], [0], [0], [1], [0, 0, 1, 1], [], []>} : vector<16x256xbf16>, vector<256x128xbf16>, vector<16x128xf32> -> vector<16x128xf32>
    %79 = vector.broadcast %4 : vector<1x128xf32> to vector<16x128xf32>
    %80 = arith.addf %78, %79 : vector<16x128xf32>
    %cst_30 = arith.constant 0.000000e+00 : f32
    %81 = vector.broadcast %cst_30 : f32 to vector<16x128xf32>
    %82 = arith.maximumf %80, %81 : vector<16x128xf32>
    %cst_31 = arith.constant dense<0.000000e+00> : vector<16xf32>
    %83 = vector.multi_reduction <add>, %82, %cst_31 [1] : vector<16x128xf32> to vector<16xf32>
    %84 = vector.shape_cast %83 : vector<16xf32> to vector<16x1xf32>
    %cst_32 = arith.constant 3.125000e-02 : f32
    %85 = vector.broadcast %cst_32 : f32 to vector<16x1xf32>
    %86 = arith.mulf %84, %85 : vector<16x1xf32>
    %87 = arith.mulf %82, %82 : vector<16x128xf32>
    %cst_33 = arith.constant dense<0.000000e+00> : vector<16xf32>
    %88 = vector.multi_reduction <add>, %87, %cst_33 [1] : vector<16x128xf32> to vector<16xf32>
    %89 = vector.shape_cast %88 : vector<16xf32> to vector<16x1xf32>
    %cst_34 = arith.constant 3.125000e-02 : f32
    %90 = vector.broadcast %cst_34 : f32 to vector<16x1xf32>
    %91 = arith.mulf %89, %90 : vector<16x1xf32>
    %92 = arith.mulf %86, %86 : vector<16x1xf32>
    %93 = arith.subf %91, %92 : vector<16x1xf32>
    %94 = vector.broadcast %86 : vector<16x1xf32> to vector<16x128xf32>
    %95 = arith.subf %82, %94 : vector<16x128xf32>
    %cst_35 = arith.constant 9.99999974E-6 : f32
    %96 = vector.broadcast %cst_35 : f32 to vector<16x1xf32>
    %97 = arith.addf %93, %96 : vector<16x1xf32>
    %98 = math.rsqrt %97 : vector<16x1xf32>
    %99 = vector.broadcast %98 : vector<16x1xf32> to vector<16x128xf32>
    %100 = arith.mulf %95, %99 : vector<16x128xf32>
    %101 = vector.broadcast %7 : vector<1x128xf32> to vector<16x128xf32>
    %102 = arith.mulf %100, %101 : vector<16x128xf32>
    %103 = vector.broadcast %9 : vector<1x128xf32> to vector<16x128xf32>
    %104 = arith.addf %102, %103 : vector<16x128xf32>
    %105 = arith.truncf %36 : vector<16x16xf32> to vector<16x16xbf16>
    %106 = arith.truncf %104 : vector<16x128xf32> to vector<16x128xbf16>
    %cst_36 = arith.constant dense<0.000000e+00> : vector<16x128xf32>
    %107 = tpu.matmul %105, %106, %cst_36 {dimension_numbers = #tpu.dot_dimension_numbers<[1], [0], [0], [1], [0, 0, 1, 1], [], []>} : vector<16x16xbf16>, vector<16x128xbf16>, vector<16x128xf32> -> vector<16x128xf32>
    %108 = tpu.concatenate %107, %104 in 1 : vector<16x128xf32>, vector<16x128xf32> -> vector<16x256xf32>
    %c2 = arith.constant 2 : index
    %c0_37 = arith.constant 0 : index
    %c0_38 = arith.constant 0 : index
    %109 = vector.load %arg5[%c2, %c0_37, %c0_38] : memref<3x256x128xbf16, #tpu.memory_space<vmem>>, vector<1x256x128xbf16>
    %110 = vector.shape_cast %109 : vector<1x256x128xbf16> to vector<256x128xbf16>
    %111 = arith.truncf %108 : vector<16x256xf32> to vector<16x256xbf16>
    %cst_39 = arith.constant dense<0.000000e+00> : vector<16x128xf32>
    %112 = tpu.matmul %111, %110, %cst_39 {dimension_numbers = #tpu.dot_dimension_numbers<[1], [0], [0], [1], [0, 0, 1, 1], [], []>} : vector<16x256xbf16>, vector<256x128xbf16>, vector<16x128xf32> -> vector<16x128xf32>
    %113 = vector.broadcast %5 : vector<1x128xf32> to vector<16x128xf32>
    %114 = arith.addf %112, %113 : vector<16x128xf32>
    %cst_40 = arith.constant 0.000000e+00 : f32
    %115 = vector.broadcast %cst_40 : f32 to vector<16x128xf32>
    %116 = arith.maximumf %114, %115 : vector<16x128xf32>
    %c0_41 = arith.constant 0 : index
    %c0_42 = arith.constant 0 : index
    %117 = vector.load %arg8[%c0_41, %c0_42] : memref<16x128xf32, #tpu.memory_space<vmem>>, vector<16x128xf32>
    tpu.vector_store %arg8[%c0_41, %c0_42], %114 {strides = array<i32>} : memref<16x128xf32, #tpu.memory_space<vmem>>, vector<16x128xf32>,
    %c0_43 = arith.constant 0 : index
    %c0_44 = arith.constant 0 : index
    %118 = vector.load %arg6[%c0_43, %c0_44] : memref<128x128xbf16, #tpu.memory_space<vmem>>, vector<128x128xbf16>
    %119 = arith.truncf %116 : vector<16x128xf32> to vector<16x128xbf16>
    %cst_45 = arith.constant dense<0.000000e+00> : vector<16x128xf32>
    %120 = tpu.matmul %119, %118, %cst_45 {dimension_numbers = #tpu.dot_dimension_numbers<[1], [0], [0], [1], [0, 0, 1, 1], [], []>} : vector<16x128xbf16>, vector<128x128xbf16>, vector<16x128xf32> -> vector<16x128xf32>
    %121 = vector.broadcast %10 : vector<1x128xf32> to vector<16x128xf32>
    %122 = arith.addf %120, %121 : vector<16x128xf32>
    %123 = tpu.iota {dimensions = array<i32: 1>} : vector<1x128xi32>
    %c4_i32 = arith.constant 4 : i32
    %124 = vector.broadcast %c4_i32 : i32 to vector<1x128xi32>
    %125 = arith.cmpi slt, %123, %124 : vector<1x128xi32>
    %cst_46 = arith.constant -1.000000e+30 : f32
    %126 = vector.shape_cast %125 : vector<1x128xi1> to vector<1x128xi1>
    %127 = vector.broadcast %126 : vector<1x128xi1> to vector<16x128xi1>
    %128 = vector.broadcast %cst_46 : f32 to vector<16x128xf32>
    %129 = arith.select %127, %122, %128 : vector<16x128xi1>, vector<16x128xf32>
    %cst_47 = arith.constant dense<0xFF800000> : vector<16xf32>
    %130 = vector.multi_reduction <maximumf>, %129, %cst_47 [1] : vector<16x128xf32> to vector<16xf32>
    %131 = vector.shape_cast %130 : vector<16xf32> to vector<16x1xf32>
    %132 = vector.broadcast %131 : vector<16x1xf32> to vector<16x128xf32>
    %133 = arith.subf %129, %132 : vector<16x128xf32>
    %134 = math.exp %133 : vector<16x128xf32>
    %cst_48 = arith.constant dense<0.000000e+00> : vector<16xf32>
    %135 = vector.multi_reduction <add>, %134, %cst_48 [1] : vector<16x128xf32> to vector<16xf32>
    %136 = vector.shape_cast %135 : vector<16xf32> to vector<16x1xf32>
    %137 = math.log %136 : vector<16x1xf32>
    %138 = arith.addf %131, %137 : vector<16x1xf32>
    %139 = vector.broadcast %138 : vector<16x1xf32> to vector<16x128xf32>
    %140 = arith.subf %129, %139 : vector<16x128xf32>
    %c0_49 = arith.constant 0 : index
    %c0_50 = arith.constant 0 : index
    %141 = vector.load %arg9[%c0_49, %c0_50] : memref<16x128xf32, #tpu.memory_space<vmem>>, vector<16x128xf32>
    tpu.vector_store %arg9[%c0_49, %c0_50], %140 {strides = array<i32>} : memref<16x128xf32, #tpu.memory_space<vmem>>, vector<16x128xf32>,
    return
  }
}

</mosaic_0001>

<bundles_post_ra>
// kernel: gnn_stack_forward.1
= control target key start
LH: loop header
LB: loop body
LE: loop exit
PB: predicated region body
PF: predicated region fallthrough
CT: control target
= control target key end

     0   :  { %15 = vsyncpa [#allocation3], 0  ;;  %s2901_s0 = inlined_call_operand.vmem [shape: f32[16,384], index: 0, kind: input, shape index: {}]   ;;  %s2902_s1 = inlined_call_operand.hbm [shape: f32[16,16], index: 1, kind: input, shape index: {}]   ;;  %s2903_s2 = inlined_call_operand.hbm [shape: f32[16,16], index: 2, kind: input, shape index: {}]   ;;  %s2904_s3 = inlined_call_operand.hbm [shape: bf16[256,256], index: 3, kind: input, shape index: {}]   ;;  %s2905_s4 = inlined_call_operand.vmem [shape: bf16[384,256], index: 4, kind: input, shape index: {}]   ;;  %s2906_s5 = inlined_call_operand.hbm [shape: bf16[3,256,128], index: 5, kind: input, shape index: {}]   ;;  %s2907_s6 = inlined_call_operand.hbm [shape: bf16[128,128], index: 6, kind: input, shape index: {}]   ;;  %s2908_s7 = inlined_call_operand.hbm [shape: f32[16,256], index: 7, kind: input, shape index: {}]   ;;  %s2909_s8 = inlined_call_operand.hbm [shape: f32[16,128], index: 8, kind: output, shape index: {0}]   ;;  %s2910_s9 = inlined_call_operand.vmem [shape: f32[16,128], index: 9, kind: output, shape index: {1}]  }
   0x1   :  { %16 = vsyncpa [#allocation6], 0 }
   0x2   :  { %17 = vsyncpa [#allocation9], 0 }
   0x3   :  { %18 = vsyncpa [#allocation12], 0 }
   0x4   :  { %19 = vsyncpa [#allocation4], 0  ;;  %s39_s11 = sshll.u32 %s2903_s2, 4  ;;  %s2458_s12 = smov [#allocation5]   ;;  %s40_s11 = int_to_ptr.hbm [resolvable:$true] %s39_s11 }
   0x5   :  { %s41_s13 = sshll.u32 %s2458_s12, 4  ;;  %s67_s16 = sshll.u32 %s2906_s5, 4  ;;  %s42_s13 = int_to_ptr.vmem [resolvable:$true] %s41_s13  ;;  %s68_s16 = int_to_ptr.hbm [resolvable:$true] %s67_s16 }
   0x6   :  { %s2459_s17 = smov 128   ;;  %s2460_s18 = smov 8  }
   0x7   :  { %47 = dma.hbm_to_vmem [thread:$0]  %s40_s11, 256, %s42_s13, [#allocation6], %s2459_s17, %s2459_s17, %s2460_s18  }
   0x8   :  { %s2461_s19 = smov [#allocation8]   ;;  %s2462_s21 = smov 64  }
   0x9   :  { %s69_s20 = sshll.u32 %s2461_s19, 4  ;;  %s2463_s2 = smov 4   ;;  %s70_s20 = int_to_ptr.vmem [resolvable:$true] %s69_s20 }
   0xa   :  { %75 = dma.hbm_to_vmem [thread:$0]  %s68_s16, 6144, %s70_s20, [#allocation9], %s2462_s21, %s2462_s21, %s2463_s2  }
   0xb   :  { %s26_s24 = sshll.u32 %s2902_s1, 4  ;;  %s2464_s25 = smov [#allocation2]   ;;  %s27_s24 = int_to_ptr.hbm [resolvable:$true] %s26_s24 }
   0xc   :  { %s28_s5 = sshll.u32 %s2464_s25, 4  ;;  %s52_s28 = sshll.u32 %s2904_s3, 4  ;;  %s29_s5 = int_to_ptr.vmem [resolvable:$true] %s28_s5  ;;  %s53_s28 = int_to_ptr.hbm [resolvable:$true] %s52_s28 }
   0xd   :  { %34 = dma.hbm_to_vmem [thread:$0]  %s27_s24, 256, %s29_s5, [#allocation3], %s2459_s17, %s2459_s17, %s2460_s18  }
   0xe   :  { %s2465_s29 = smov [#allocation7]   ;;  %s80_s12 = sshll.u32 %s2907_s6, 4  ;;  %s81_s12 = int_to_ptr.hbm [resolvable:$true] %s80_s12 }
   0xf   :  { %s54_s30 = sshll.u32 %s2465_s29, 4  ;;  %s93_s3 = sshll.u32 %s2908_s7, 4  ;;  %s55_s30 = int_to_ptr.vmem [resolvable:$true] %s54_s30  ;;  %s94_s3 = int_to_ptr.hbm [resolvable:$true] %s93_s3 }
  0x10   :  { %60 = dma.hbm_to_vmem [thread:$0]  %s53_s28, 4096, %s55_s30, [#allocation6], %s2459_s17, %s2459_s17, %s2460_s18  }
  0x11   :  { %s2466_s14 = smov [#allocation10]   ;;  %s2467_s16 = smov [#allocation11]  }
  0x12   :  { %s82_s15 = sshll.u32 %s2466_s14, 4  ;;  %s95_s19 = sshll.u32 %s2467_s16, 4  ;;  %s83_s15 = int_to_ptr.vmem [resolvable:$true] %s82_s15  ;;  %s96_s19 = int_to_ptr.vmem [resolvable:$true] %s95_s19 }
  0x13   :  { %88 = dma.hbm_to_vmem [thread:$0]  %s81_s12, 1024, %s83_s15, [#allocation9], %s2462_s21, %s2462_s21, %s2463_s2  }
  0x14   :  { %s2468_s20 = smov 256   ;;  %s2469_s6 = smov 16  }
  0x15   :  { %101 = dma.hbm_to_vmem [thread:$0]  %s94_s3, 512, %s96_s19, [#allocation12], %s2468_s20, %s2468_s20, %s2469_s6  }
  0x16   :  { %2448 = dma.done.wait [#allocation3], 256  }
  0x17   :  { %2449 = vsyncadd [#allocation3], 4294967040 }
  0x18   :  { %2450 = dma.done.wait [#allocation6], 4352  }
  0x19   :  { %2451 = vsyncadd [#allocation6], 4294962944 }
  0x1a   :  { %2452 = dma.done.wait [#allocation9], 7168  }
  0x1b   :  { %2453 = vsyncadd [#allocation9], 4294960128 }
  0x1c   :  { %2454 = dma.done.wait [#allocation12], 512  }
  0x1d   :  { %2455 = vsyncadd [#allocation12], 4294966784  ;;  %v1625_v0 = vld [vmem:[#allocation7 + $0x70] sm:$0xf]  ;;  %v2130_v1 = vld [vmem:[#allocation7 + $0x74] sm:$0xf0] }
  0x1e   :  { %v1689_v2 = vld [vmem:[#allocation7 + $0xf0] sm:$0xf]  ;;  %v1626_v3 = vor.u32 %v2130_v1, %v1625_v0  ;;  %v2146_v4 = vld [vmem:[#allocation7 + $0xf4] sm:$0xf0]  ;;  %v2129_v5 = vld [vmem:[#allocation7 + $0x74] sm:$0xf] }
  0x1f   :  { %v1627_v6 = vld [vmem:[#allocation7 + $0x78] sm:$0xf0]  ;;  %v1690_v7 = vor.u32 %v2146_v4, %v1689_v2  ;;  %v2145_v9 = vld [vmem:[#allocation7 + $0xf4] sm:$0xf]  ;;  %v1617_v11 = vld [vmem:[#allocation7 + $0x60] sm:$0xf] }
  0x20   :  { %v1630_v8 = vor.u32 %v2129_v5, %v1627_v6  ;;  %v1691_v10 = vld [vmem:[#allocation7 + $0xf8] sm:$0xf0]  ;;  %332 = vmatpush.bf16.msra.mxu0 %v1626_v3  ;;  %v2128_v13 = vld [vmem:[#allocation7 + $0x64] sm:$0xf0]  ;;  %v1681_v14 = vld [vmem:[#allocation7 + $0xe0] sm:$0xf] }
  0x21   :  { %v1694_v12 = vor.u32 %v2145_v9, %v1691_v10  ;;  %v2144_v15 = vld [vmem:[#allocation7 + $0xe4] sm:$0xf0]  ;;  %346 = vmatpush.bf16.msra.mxu1 %v1690_v7  ;;  %v1618_v16 = vor.u32 %v2128_v13, %v1617_v11  ;;  %v2127_v18 = vld [vmem:[#allocation7 + $0x64] sm:$0xf]  ;;  %v1619_v19 = vld [vmem:[#allocation7 + $0x68] sm:$0xf0] }
  0x22   :  { %360 = vmatpush.bf16.msra.mxu2 %v1630_v8  ;;  %v1682_v17 = vor.u32 %v2144_v15, %v1681_v14  ;;  %v2143_v20 = vld [vmem:[#allocation7 + $0xe4] sm:$0xf]  ;;  %v1622_v21 = vor.u32 %v2127_v18, %v1619_v19  ;;  %v1683_v22 = vld [vmem:[#allocation7 + $0xe8] sm:$0xf0]  ;;  %v1609_v23 = vld [vmem:[#allocation7 + $0x50] sm:$0xf] }
  0x23   :  { %374 = vmatpush.bf16.msra.mxu3 %v1694_v12  ;;  %v2126_v24 = vld [vmem:[#allocation7 + $0x54] sm:$0xf0]  ;;  %v1686_v25 = vor.u32 %v2143_v20, %v1683_v22  ;;  %v1673_v26 = vld [vmem:[#allocation7 + $0xd0] sm:$0xf]  ;;  %v2125_v28 = vld [vmem:[#allocation7 + $0x54] sm:$0xf] }
  0x24   :  { %v2142_v27 = vld [vmem:[#allocation7 + $0xd4] sm:$0xf0]  ;;  %333 = vmatpush.bf16.msra.mxu0 %v1618_v16  ;;  %v1610_v29 = vor.u32 %v2126_v24, %v1609_v23  ;;  %v1611_v30 = vld [vmem:[#allocation7 + $0x58] sm:$0xf0]  ;;  %v2141_v31 = vld [vmem:[#allocation7 + $0xd4] sm:$0xf] }
  0x25   :  { %v1675_v32 = vld [vmem:[#allocation7 + $0xd8] sm:$0xf0]  ;;  %347 = vmatpush.bf16.msra.mxu1 %v1682_v17  ;;  %v1674_v33 = vor.u32 %v2142_v27, %v1673_v26  ;;  %v1614_v34 = vor.u32 %v2125_v28, %v1611_v30  ;;  %v1601_v35 = vld [vmem:[#allocation7 + $0x40] sm:$0xf]  ;;  %v2124_v36 = vld [vmem:[#allocation7 + $0x44] sm:$0xf0] }
  0x26   :  { %361 = vmatpush.bf16.msra.mxu2 %v1622_v21  ;;  %v1665_v37 = vld [vmem:[#allocation7 + $0xc0] sm:$0xf]  ;;  %v1678_v38 = vor.u32 %v2141_v31, %v1675_v32  ;;  %v2140_v39 = vld [vmem:[#allocation7 + $0xc4] sm:$0xf0]  ;;  %v2123_v40 = vld [vmem:[#allocation7 + $0x44] sm:$0xf]  ;;  %v1602_v44 = vor.u32 %v2124_v36, %v1601_v35 }
  0x27   :  { %375 = vmatpush.bf16.msra.mxu3 %v1686_v25  ;;  %v1603_v41 = vld [vmem:[#allocation7 + $0x48] sm:$0xf0]  ;;  %v2139_v42 = vld [vmem:[#allocation7 + $0xc4] sm:$0xf]  ;;  %v1666_v45 = vor.u32 %v2140_v39, %v1665_v37  ;;  %v1593_v47 = vld [vmem:[#allocation7 + $0x30] sm:$0xf] }
  0x28   :  { %v1667_v43 = vld [vmem:[#allocation7 + $0xc8] sm:$0xf0]  ;;  %334 = vmatpush.bf16.msra.mxu0 %v1610_v29  ;;  %v1606_v46 = vor.u32 %v2123_v40, %v1603_v41  ;;  %v2122_v48 = vld [vmem:[#allocation7 + $0x34] sm:$0xf0]  ;;  %v1657_v49 = vld [vmem:[#allocation7 + $0xb0] sm:$0xf] }
  0x29   :  { %348 = vmatpush.bf16.msra.mxu1 %v1674_v33  ;;  %v1670_v50 = vor.u32 %v2139_v42, %v1667_v43  ;;  %v2138_v51 = vld [vmem:[#allocation7 + $0xb4] sm:$0xf0]  ;;  %v2121_v52 = vld [vmem:[#allocation7 + $0x34] sm:$0xf]  ;;  %v1595_v53 = vld [vmem:[#allocation7 + $0x38] sm:$0xf0]  ;;  %v1594_v56 = vor.u32 %v2122_v48, %v1593_v47 }
  0x2a   :  { %362 = vmatpush.bf16.msra.mxu2 %v1614_v34  ;;  %v2137_v54 = vld [vmem:[#allocation7 + $0xb4] sm:$0xf]  ;;  %v1659_v55 = vld [vmem:[#allocation7 + $0xb8] sm:$0xf0]  ;;  %v1658_v57 = vor.u32 %v2138_v51, %v1657_v49  ;;  %v1598_v58 = vor.u32 %v2121_v52, %v1595_v53  ;;  %v1585_v59 = vld [vmem:[#allocation7 + $0x20] sm:$0xf] }
  0x2b   :  { %376 = vmatpush.bf16.msra.mxu3 %v1678_v38  ;;  %v2120_v60 = vld [vmem:[#allocation7 + $0x24] sm:$0xf0]  ;;  %v1649_v61 = vld [vmem:[#allocation7 + $0xa0] sm:$0xf]  ;;  %v1662_v62 = vor.u32 %v2137_v54, %v1659_v55  ;;  %v2119_v0 = vld [vmem:[#allocation7 + $0x24] sm:$0xf] }
  0x2c   :  { %335 = vmatpush.bf16.msra.mxu0 %v1602_v44  ;;  %v2136_v63 = vld [vmem:[#allocation7 + $0xa4] sm:$0xf0]  ;;  %v1587_v1 = vld [vmem:[#allocation7 + $0x28] sm:$0xf0]  ;;  %v2135_v2 = vld [vmem:[#allocation7 + $0xa4] sm:$0xf]  ;;  %v1586_v4 = vor.u32 %v2120_v60, %v1585_v59 }
  0x2d   :  { %349 = vmatpush.bf16.msra.mxu1 %v1666_v45  ;;  %v1651_v3 = vld [vmem:[#allocation7 + $0xa8] sm:$0xf0]  ;;  %v1650_v5 = vor.u32 %v2136_v63, %v1649_v61  ;;  %v1590_v6 = vor.u32 %v2119_v0, %v1587_v1  ;;  %v1577_v7 = vld [vmem:[#allocation7 + $0x10] sm:$0xf]  ;;  %v2118_v8 = vld [vmem:[#allocation7 + $0x14] sm:$0xf0] }
  0x2e   :  { %363 = vmatpush.bf16.msra.mxu2 %v1606_v46  ;;  %v1641_v9 = vld [vmem:[#allocation7 + $0x90] sm:$0xf]  ;;  %v1654_v10 = vor.u32 %v2135_v2, %v1651_v3  ;;  %v2134_v11 = vld [vmem:[#allocation7 + $0x94] sm:$0xf0]  ;;  %v2117_v12 = vld [vmem:[#allocation7 + $0x14] sm:$0xf]  ;;  %v1578_v16 = vor.u32 %v2118_v8, %v1577_v7 }
  0x2f   :  { %377 = vmatpush.bf16.msra.mxu3 %v1670_v50  ;;  %v1579_v13 = vld [vmem:[#allocation7 + $0x18] sm:$0xf0]  ;;  %v2133_v14 = vld [vmem:[#allocation7 + $0x94] sm:$0xf]  ;;  %v1569_v17 = vld [vmem:[#allocation7] sm:$0xf]  ;;  %v1642_v19 = vor.u32 %v2134_v11, %v1641_v9 }
  0x30   :  { %336 = vmatpush.bf16.msra.mxu0 %v1594_v56  ;;  %v1643_v15 = vld [vmem:[#allocation7 + $0x98] sm:$0xf0]  ;;  %v2116_v18 = vld [vmem:[#allocation7 + $0x4] sm:$0xf0]  ;;  %v1582_v20 = vor.u32 %v2117_v12, %v1579_v13  ;;  %v1633_v21 = vld [vmem:[#allocation7 + $0x80] sm:$0xf] }
  0x31   :  { %350 = vmatpush.bf16.msra.mxu1 %v1658_v57  ;;  %v2132_v22 = vld [vmem:[#allocation7 + $0x84] sm:$0xf0]  ;;  %v2115_v23 = vld [vmem:[#allocation7 + $0x4] sm:$0xf]  ;;  %v1646_v24 = vor.u32 %v2133_v14, %v1643_v15  ;;  %v1571_v25 = vld [vmem:[#allocation7 + $0x8] sm:$0xf0]  ;;  %v1570_v31 = vor.u32 %v2116_v18, %v1569_v17 }
  0x32   :  { %364 = vmatpush.bf16.msra.mxu2 %v1598_v58  ;;  %v2131_v26 = vld [vmem:[#allocation7 + $0x84] sm:$0xf]  ;;  %v1635_v27 = vld [vmem:[#allocation7 + $0x88] sm:$0xf0]  ;;  %v1753_v29 = vld [vmem:[%s2905_s4 + $0x70] sm:$0xf]  ;;  %v1634_v35 = vor.u32 %v2132_v22, %v1633_v21  ;;  %v1574_v36 = vor.u32 %v2115_v23, %v1571_v25 }
  0x33   :  { %378 = vmatpush.bf16.msra.mxu3 %v1662_v62  ;;  %v130_v28 = vld [vmem:[%s2901_s0] sm:$0xff]  ;;  %v2162_v30 = vld [vmem:[%s2905_s4 + $0x74] sm:$0xf0]  ;;  %v1817_v33 = vld [vmem:[%s2905_s4 + $0xf0] sm:$0xf]  ;;  %v1638_v39 = vor.u32 %v2131_v26, %v1635_v27  ;;  %vm775_vm0 = vcmask 130048  }
  0x34   :  { %337 = vmatpush.bf16.msra.mxu0 %v1586_v4  ;;  %v133_v32 = vld [vmem:[%s2901_s0 + $0x18] sm:$0xff]  ;;  %v131_v37 = vld [vmem:[%s2901_s0 + $0x8] sm:$0xff]  ;;  %v134_v38 = vld [vmem:[%s2901_s0 + $0x20] sm:$0xff]  ;;  %v1754_v40 = vor.u32 %v2162_v30, %v1753_v29  ;;  %s1547_s24 = sshll.u32 %s2909_s8, 4  ;;  %s1548_s24 = int_to_ptr.hbm [resolvable:$true] %s1547_s24 }
  0x35   :  { %351 = vmatpush.bf16.msra.mxu1 %v1650_v5  ;;  %v2178_v34 = vld [vmem:[%s2905_s4 + $0xf4] sm:$0xf0]  ;;  %v1745_v41 = vld [vmem:[%s2905_s4 + $0x60] sm:$0xf]  ;;  %v1881_v42 = vld [vmem:[%s2905_s4 + $0x170] sm:$0xf]  ;;  %v168_v44 = vpack.c.bf16 %v133_v32, %v130_v28  ;;  %v169_v49 = vpack.c.bf16 %v134_v38, %v131_v37 }
  0x36   :  { %365 = vmatpush.bf16.msra.mxu2 %v1590_v6  ;;  %v2194_v43 = vld [vmem:[%s2905_s4 + $0x174] sm:$0xf0]  ;;  %v2160_v45 = vld [vmem:[%s2905_s4 + $0x64] sm:$0xf0]  ;;  %v1818_v46 = vor.u32 %v2178_v34, %v1817_v33  ;;  %v2161_v47 = vld [vmem:[%s2905_s4 + $0x74] sm:$0xf] }
  0x37   :  { %379 = vmatpush.bf16.msra.mxu3 %v1654_v10  ;;  %v1755_v48 = vld [vmem:[%s2905_s4 + $0x78] sm:$0xf0]  ;;  %v1809_v50 = vld [vmem:[%s2905_s4 + $0xe0] sm:$0xf]  ;;  %v2176_v51 = vld [vmem:[%s2905_s4 + $0xe4] sm:$0xf0]  ;;  %v1882_v52 = vor.u32 %v2194_v43, %v1881_v42  ;;  %v1746_v53 = vor.u32 %v2160_v45, %v1745_v41 }
  0x38   :  { %338 = vmatpush.bf16.msra.mxu0 %v1578_v16  ;;  %v1737_v54 = vld [vmem:[%s2905_s4 + $0x50] sm:$0xf]  ;;  %v1758_v55 = vor.u32 %v2161_v47, %v1755_v48  ;;  %v1873_v56 = vld [vmem:[%s2905_s4 + $0x160] sm:$0xf]  ;;  %v2192_v57 = vld [vmem:[%s2905_s4 + $0x164] sm:$0xf0]  ;;  %v1810_v59 = vor.u32 %v2176_v51, %v1809_v50 }
  0x39   :  { %352 = vmatpush.bf16.msra.mxu1 %v1642_v19  ;;  %v2158_v58 = vld [vmem:[%s2905_s4 + $0x54] sm:$0xf0]  ;;  %v2159_v60 = vld [vmem:[%s2905_s4 + $0x64] sm:$0xf]  ;;  %v1747_v61 = vld [vmem:[%s2905_s4 + $0x68] sm:$0xf0]  ;;  %v1874_v0 = vor.u32 %v2192_v57, %v1873_v56 }
  0x3a   :  { %366 = vmatpush.bf16.msra.mxu2 %v1582_v20  ;;  %v1801_v62 = vld [vmem:[%s2905_s4 + $0xd0] sm:$0xf]  ;;  %v2174_v63 = vld [vmem:[%s2905_s4 + $0xd4] sm:$0xf0]  ;;  %v1738_v1 = vor.u32 %v2158_v58, %v1737_v54  ;;  %v1729_v2 = vld [vmem:[%s2905_s4 + $0x40] sm:$0xf]  ;;  %v1750_v3 = vor.u32 %v2159_v60, %v1747_v61 }
  0x3b   :  { %380 = vmatpush.bf16.msra.mxu3 %v1646_v24  ;;  %v1865_v4 = vld [vmem:[%s2905_s4 + $0x150] sm:$0xf]  ;;  %v2190_v5 = vld [vmem:[%s2905_s4 + $0x154] sm:$0xf0]  ;;  %v2156_v6 = vld [vmem:[%s2905_s4 + $0x44] sm:$0xf0]  ;;  %v1802_v7 = vor.u32 %v2174_v63, %v1801_v62 }
  0x3c   :  { %339 = vmatpush.bf16.msra.mxu0 %v1570_v31  ;;  %v2157_v8 = vld [vmem:[%s2905_s4 + $0x54] sm:$0xf]  ;;  %v1739_v9 = vld [vmem:[%s2905_s4 + $0x58] sm:$0xf0]  ;;  %v1793_v10 = vld [vmem:[%s2905_s4 + $0xc0] sm:$0xf]  ;;  %v1866_v12 = vor.u32 %v2190_v5, %v1865_v4  ;;  %v1730_v13 = vor.u32 %v2156_v6, %v1729_v2 }
  0x3d   :  { %353 = vmatpush.bf16.msra.mxu1 %v1634_v35  ;;  %v2172_v11 = vld [vmem:[%s2905_s4 + $0xc4] sm:$0xf0]  ;;  %v1721_v14 = vld [vmem:[%s2905_s4 + $0x30] sm:$0xf]  ;;  %v1742_v15 = vor.u32 %v2157_v8, %v1739_v9  ;;  %v2154_v16 = vld [vmem:[%s2905_s4 + $0x34] sm:$0xf0] }
  0x3e   :  { %367 = vmatpush.bf16.msra.mxu2 %v1574_v36  ;;  %v1794_v17 = vor.u32 %v2172_v11, %v1793_v10  ;;  %v2155_v18 = vld [vmem:[%s2905_s4 + $0x44] sm:$0xf]  ;;  %v1731_v19 = vld [vmem:[%s2905_s4 + $0x48] sm:$0xf0]  ;;  %v1785_v20 = vld [vmem:[%s2905_s4 + $0xb0] sm:$0xf]  ;;  %v1722_v22 = vor.u32 %v2154_v16, %v1721_v14 }
  0x3f   :  { %381 = vmatpush.bf16.msra.mxu3 %v1638_v39  ;;  %340 = vmatmul.bf16.vlgmr.msra.gmra.mxu0 %v168_v44  ;;  %v2170_v21 = vld [vmem:[%s2905_s4 + $0xb4] sm:$0xf0]  ;;  %v1734_v23 = vor.u32 %v2155_v18, %v1731_v19  ;;  %v1713_v24 = vld [vmem:[%s2905_s4 + $0x20] sm:$0xf]  ;;  %v2152_v25 = vld [vmem:[%s2905_s4 + $0x24] sm:$0xf0] }
  0x40   :  { %687 = vmatpush.bf16.msrb.mxu0 %v1754_v40  ;;  %354 = vmatmul.bf16.vlgmr.msra.gmra.mxu1 %v169_v49  ;;  %v1786_v26 = vor.u32 %v2170_v21, %v1785_v20  ;;  %v1777_v27 = vld [vmem:[%s2905_s4 + $0xa0] sm:$0xf]  ;;  %v2168_v28 = vld [vmem:[%s2905_s4 + $0xa4] sm:$0xf0]  ;;  %v1714_v29 = vor.u32 %v2152_v25, %v1713_v24  ;;  %v1705_v30 = vld [vmem:[%s2905_s4 + $0x10] sm:$0xf] }
  0x41   :  { %701 = vmatpush.bf16.msrb.mxu1 %v1818_v46  ;;  %368 = vmatmul.bf16.vlgmr.msra.gmra.mxu2 %v168_v44  ;;  %v2150_v31 = vld [vmem:[%s2905_s4 + $0x14] sm:$0xf0]  ;;  %v1778_v32 = vor.u32 %v2168_v28, %v1777_v27  ;;  %v1857_v34 = vld [vmem:[%s2905_s4 + $0x140] sm:$0xf]  ;;  %v2188_v35 = vld [vmem:[%s2905_s4 + $0x144] sm:$0xf0] }
  0x42   :  { %382 = vmatmul.bf16.vlgmr.msra.gmra.mxu3 %v169_v49  ;;  %715 = vmatpush.bf16.msrb.mxu2 %v1882_v52  ;;  %v1706_v33 = vor.u32 %v2150_v31, %v1705_v30  ;;  %v1858_v36 = vor.u32 %v2188_v35, %v1857_v34  ;;  %v1697_v37 = vld [vmem:[%s2905_s4] sm:$0xf]  ;;  %v2148_v38 = vld [vmem:[%s2905_s4 + $0x4] sm:$0xf0]  ;;  %v2153_v40 = vld [vmem:[%s2905_s4 + $0x34] sm:$0xf] }
  0x43   :  { %729 = vmatpush.bf16.msrb.mxu3 %v1758_v55  ;;  %v1698_v39 = vor.u32 %v2148_v38, %v1697_v37  ;;  %v1723_v41 = vld [vmem:[%s2905_s4 + $0x38] sm:$0xf0]  ;;  %v2177_v42 = vld [vmem:[%s2905_s4 + $0xf4] sm:$0xf]  ;;  %v1769_v45 = vld [vmem:[%s2905_s4 + $0x90] sm:$0xf] }
  0x44   :  { %688 = vmatpush.bf16.msrb.mxu0 %v1746_v53  ;;  %v1726_v43 = vor.u32 %v2153_v40, %v1723_v41  ;;  %v1819_v44 = vld [vmem:[%s2905_s4 + $0xf8] sm:$0xf0]  ;;  %v2166_v46 = vld [vmem:[%s2905_s4 + $0x94] sm:$0xf0]  ;;  %v1849_v49 = vld [vmem:[%s2905_s4 + $0x130] sm:$0xf] }
  0x45   :  { %702 = vmatpush.bf16.msrb.mxu1 %v1810_v59  ;;  %v1822_v47 = vor.u32 %v2177_v42, %v1819_v44  ;;  %v1770_v48 = vor.u32 %v2166_v46, %v1769_v45  ;;  %v2186_v50 = vld [vmem:[%s2905_s4 + $0x134] sm:$0xf0]  ;;  %v2151_v52 = vld [vmem:[%s2905_s4 + $0x24] sm:$0xf]  ;;  %v1715_v53 = vld [vmem:[%s2905_s4 + $0x28] sm:$0xf0] }
  0x46   :  { %716 = vmatpush.bf16.msrb.mxu2 %v1874_v0  ;;  %v1850_v51 = vor.u32 %v2186_v50, %v1849_v49  ;;  %v1718_v54 = vor.u32 %v2151_v52, %v1715_v53  ;;  %v2175_v55 = vld [vmem:[%s2905_s4 + $0xe4] sm:$0xf]  ;;  %v1811_v56 = vld [vmem:[%s2905_s4 + $0xe8] sm:$0xf0]  ;;  %v1761_v58 = vld [vmem:[%s2905_s4 + $0x80] sm:$0xf] }
  0x47   :  { %730 = vmatpush.bf16.msrb.mxu3 %v1750_v3  ;;  %v1814_v57 = vor.u32 %v2175_v55, %v1811_v56  ;;  %v2164_v59 = vld [vmem:[%s2905_s4 + $0x84] sm:$0xf0]  ;;  %v1841_v60 = vld [vmem:[%s2905_s4 + $0x120] sm:$0xf]  ;;  %v2193_v63 = vld [vmem:[%s2905_s4 + $0x174] sm:$0xf] }
  0x48   :  { %689 = vmatpush.bf16.msrb.mxu0 %v1738_v1  ;;  %v1762_v61 = vor.u32 %v2164_v59, %v1761_v58  ;;  %v2184_v62 = vld [vmem:[%s2905_s4 + $0x124] sm:$0xf0]  ;;  %v1883_v0 = vld [vmem:[%s2905_s4 + $0x178] sm:$0xf0]  ;;  %v2149_v3 = vld [vmem:[%s2905_s4 + $0x14] sm:$0xf] }
  0x49   :  { %703 = vmatpush.bf16.msrb.mxu1 %v1802_v7  ;;  %v1842_v1 = vor.u32 %v2184_v62, %v1841_v60  ;;  %v1886_v2 = vor.u32 %v2193_v63, %v1883_v0  ;;  %v1707_v4 = vld [vmem:[%s2905_s4 + $0x18] sm:$0xf0]  ;;  %v2173_v5 = vld [vmem:[%s2905_s4 + $0xd4] sm:$0xf]  ;;  %v1833_v9 = vld [vmem:[%s2905_s4 + $0x110] sm:$0xf] }
  0x4a   :  { %717 = vmatpush.bf16.msrb.mxu2 %v1866_v12  ;;  %v1710_v6 = vor.u32 %v2149_v3, %v1707_v4  ;;  %v1803_v7 = vld [vmem:[%s2905_s4 + $0xd8] sm:$0xf0]  ;;  %v2182_v10 = vld [vmem:[%s2905_s4 + $0x114] sm:$0xf0]  ;;  %v2191_v11 = vld [vmem:[%s2905_s4 + $0x164] sm:$0xf] }
  0x4b   :  { %731 = vmatpush.bf16.msrb.mxu3 %v1742_v15  ;;  %v1806_v8 = vor.u32 %v2173_v5, %v1803_v7  ;;  %v1834_v12 = vor.u32 %v2182_v10, %v1833_v9  ;;  %v2147_v15 = vld [vmem:[%s2905_s4 + $0x4] sm:$0xf]  ;;  %v1699_v16 = vld [vmem:[%s2905_s4 + $0x8] sm:$0xf0]  ;;  %v1825_v21 = vld [vmem:[%s2905_s4 + $0x100] sm:$0xf] }
  0x4c   :  { %690 = vmatpush.bf16.msrb.mxu0 %v1730_v13  ;;  %v1875_v13 = vld [vmem:[%s2905_s4 + $0x168] sm:$0xf0]  ;;  %v1702_v18 = vor.u32 %v2147_v15, %v1699_v16  ;;  %v1867_v25 = vld [vmem:[%s2905_s4 + $0x158] sm:$0xf0]  ;;  %v2187_v35 = vld [vmem:[%s2905_s4 + $0x144] sm:$0xf] }
  0x4d   :  { %704 = vmatpush.bf16.msrb.mxu1 %v1794_v17  ;;  %v1878_v14 = vor.u32 %v2191_v11, %v1875_v13  ;;  %v2171_v17 = vld [vmem:[%s2905_s4 + $0xc4] sm:$0xf]  ;;  %v1795_v19 = vld [vmem:[%s2905_s4 + $0xc8] sm:$0xf0]  ;;  %v1787_v30 = vld [vmem:[%s2905_s4 + $0xb8] sm:$0xf0] }
  0x4e   :  { %718 = vmatpush.bf16.msrb.mxu2 %v1858_v36  ;;  %v1798_v20 = vor.u32 %v2171_v17, %v1795_v19  ;;  %v135_v27 = vld [vmem:[%s2901_s0 + $0x28] sm:$0xff]  ;;  %v2167_v38 = vld [vmem:[%s2905_s4 + $0xa4] sm:$0xf]  ;;  %v2185_v41 = vld [vmem:[%s2905_s4 + $0x134] sm:$0xf] }
  0x4f   :  { %732 = vmatpush.bf16.msrb.mxu3 %v1734_v23  ;;  %v2189_v23 = vld [vmem:[%s2905_s4 + $0x154] sm:$0xf]  ;;  %v1859_v36 = vld [vmem:[%s2905_s4 + $0x148] sm:$0xf0]  ;;  %v1851_v42 = vld [vmem:[%s2905_s4 + $0x138] sm:$0xf0] }
  0x50   :  { %691 = vmatpush.bf16.msrb.mxu0 %v1722_v22  ;;  %v2180_v22 = vld [vmem:[%s2905_s4 + $0x104] sm:$0xf0]  ;;  %v1870_v28 = vor.u32 %v2189_v23, %v1867_v25  ;;  %v1862_v37 = vor.u32 %v2187_v35, %v1859_v36  ;;  %v2165_v44 = vld [vmem:[%s2905_s4 + $0x94] sm:$0xf]  ;;  %v1771_v45 = vld [vmem:[%s2905_s4 + $0x98] sm:$0xf0] }
  0x51   :  { %705 = vmatpush.bf16.msrb.mxu1 %v1786_v26  ;;  %v1826_v24 = vor.u32 %v2180_v22, %v1825_v21  ;;  %v132_v26 = vld [vmem:[%s2901_s0 + $0x10] sm:$0xff]  ;;  %v2183_v46 = vld [vmem:[%s2905_s4 + $0x124] sm:$0xf]  ;;  %v1763_v50 = vld [vmem:[%s2905_s4 + $0x88] sm:$0xf0] }
  0x52   :  { %719 = vmatpush.bf16.msrb.mxu2 %v1850_v51  ;;  %v392_v31 = vmax.f32 %v132_v26, 0.0  ;;  %v2163_v49 = vld [vmem:[%s2905_s4 + $0x84] sm:$0xf]  ;;  %v2181_v52 = vld [vmem:[%s2905_s4 + $0x114] sm:$0xf]  ;;  %v128_v0 = vld [vmem:[#allocation11 + $0x8] sm:$0xff] }
  0x53   :  { %733 = vmatpush.bf16.msrb.mxu3 %v1726_v43  ;;  %v1854_v43 = vor.u32 %v2185_v41, %v1851_v42  ;;  %v1835_v53 = vld [vmem:[%s2905_s4 + $0x118] sm:$0xf0]  ;;  %v2851_v55 = vld [vmem:[#allocation11] sm:$0xff] }
  0x54   :  { %692 = vmatpush.bf16.msrb.mxu0 %v1714_v29  ;;  %v2169_v29 = vld [vmem:[%s2905_s4 + $0xb4] sm:$0xf]  ;;  %v1838_v56 = vor.u32 %v2181_v52, %v1835_v53  ;;  %v170_v58 = vperm.slane %v2851_v55, 0  ;;  %v2179_v60 = vld [vmem:[%s2905_s4 + $0x104] sm:$0xf]  ;;  %v445_v22 = vperm.slane %v2851_v55, 1 }
  0x55   :  { %706 = vmatpush.bf16.msrb.mxu1 %v1778_v32  ;;  %v393_v32 = vmax.f32 %v135_v27, 0.0 }
  0x56   :  { %720 = vmatpush.bf16.msrb.mxu2 %v1842_v1 }
  0x57   :  { %734 = vmatpush.bf16.msrb.mxu3 %v1718_v54  ;;  %v2806_v34 = vpack.c.bf16 %v393_v32, %v392_v31  ;;  %v1766_v54 = vor.u32 %v2163_v49, %v1763_v50 }
  0x58   :  { %693 = vmatpush.bf16.msrb.mxu0 %v1706_v33  ;;  %v1790_v33 = vor.u32 %v2169_v29, %v1787_v30 }
  0x59   :  { %707 = vmatpush.bf16.msrb.mxu1 %v1770_v48  ;;  %v1843_v48 = vld [vmem:[%s2905_s4 + $0x128] sm:$0xf0] }
  0x5a   :  { %721 = vmatpush.bf16.msrb.mxu2 %v1834_v12  ;;  %v1846_v51 = vor.u32 %v2183_v46, %v1843_v48 }
  0x5b   :  { %735 = vmatpush.bf16.msrb.mxu3 %v1710_v6 }
  0x5c   :  { %694 = vmatpush.bf16.msrb.mxu0 %v1698_v39  ;;  %v1779_v39 = vld [vmem:[%s2905_s4 + $0xa8] sm:$0xf0] }
  0x5d   :  { %708 = vmatpush.bf16.msrb.mxu1 %v1762_v61  ;;  %v1782_v40 = vor.u32 %v2167_v38, %v1779_v39  ;;  %v1827_v61 = vld [vmem:[%s2905_s4 + $0x108] sm:$0xf0]  ;;  %s2470_s4 = smov [#allocation13]  }
  0x5e   :  { %722 = vmatpush.bf16.msrb.mxu2 %v1826_v24  ;;  %v1830_v62 = vor.u32 %v2179_v60, %v1827_v61  ;;  %v2202_v61 = vld [vmem:[#allocation8 + $0x38] sm:$0xff]  ;;  %s1545_s2 = sshll.u32 %s2470_s4, 4  ;;  %s1546_s2 = int_to_ptr.vmem [resolvable:$true] %s1545_s2 }
  0x5f   :  { %736 = vmatpush.bf16.msrb.mxu3 %v1702_v18 }
  0x60   :  { %743 = vmatpush.bf16.msra.mxu0 %v1822_v47  ;;  %v1774_v47 = vor.u32 %v2165_v44, %v1771_v45  ;;  %v772_v44 = vld [vmem:[#allocation2 + $0x8] sm:$0xff] }
  0x61   :  { %757 = vmatpush.bf16.msra.mxu1 %v1886_v2  ;;  %723 = vmatmul.bf16.vlgmr.msrb.gmra.mxu2 %v2806_v34  ;;  %v171_v2 = vperm.slane %v128_v0, 0 }
  0x64   :  { %744 = vmatpush.bf16.msra.mxu0 %v1814_v57 }
  0x65   :  { %758 = vmatpush.bf16.msra.mxu1 %v1878_v14 }
  0x68   :  { %745 = vmatpush.bf16.msra.mxu0 %v1806_v8 }
  0x69   :  { %759 = vmatpush.bf16.msra.mxu1 %v1870_v28 }
  0x6c   :  { %746 = vmatpush.bf16.msra.mxu0 %v1798_v20 }
  0x6d   :  { %760 = vmatpush.bf16.msra.mxu1 %v1862_v37 }
  0x70   :  { %747 = vmatpush.bf16.msra.mxu0 %v1790_v33  ;;  %v446_v33 = vperm.slane %v128_v0, 1  ;;  %v2208_v0 = vld [vmem:[#allocation8 + $0x68] sm:$0xff] }
  0x71   :  { %761 = vmatpush.bf16.msra.mxu1 %v1854_v43  ;;  %v771_v43 = vld [vmem:[#allocation2] sm:$0xff] }
  0x72   :  { %v773_v46 = vpack.c.bf16 %v772_v44, %v771_v43 }
  0x74   :  { %748 = vmatpush.bf16.msra.mxu0 %v1782_v40 }
  0x75   :  { %762 = vmatpush.bf16.msra.mxu1 %v1846_v51 }
  0x78   :  { %749 = vmatpush.bf16.msra.mxu0 %v1774_v47 }
  0x79   :  { %763 = vmatpush.bf16.msra.mxu1 %v1838_v56  ;;  %v795_v56 = vld [vmem:[#allocation5] sm:$0xff] }
  0x7c   :  { %750 = vmatpush.bf16.msra.mxu0 %v1766_v54 }
  0x7d   :  { %764 = vmatpush.bf16.msra.mxu1 %v1830_v62  ;;  %v2209_v62 = vld [vmem:[#allocation8 + $0x70] sm:$0xff] }
  0xbc   :  { %v341_v57 = vpop.f32.mrf.mxu0 }
  0xbd   :  { %v355_v59 = vpop.f32.mrf.mxu1  ;;  %v342_v63 = vadd.f32 %v341_v57, %v170_v58  ;;  %v796_v57 = vld [vmem:[#allocation5 + $0x8] sm:$0xff] }
  0xbe   :  { %v2863_v60 = vpack.c.bf16 %v796_v57, %v795_v56  ;;  %v1020_v57 = vperm.slane %v2851_v55, 3 }
  0xbf   :  { %v356_v5 = vadd.f32 %v355_v59, %v342_v63  ;;  %v2201_v63 = vld [vmem:[#allocation8 + $0x30] sm:$0xff] }
  0xc1   :  { %v388_v10 = vmax.f32 %v356_v5, 0.0  ;;  %v2198_v5 = vld [vmem:[#allocation8 + $0x18] sm:$0xff] }
  0xc4   :  { %v369_v1 = vpop.f32.mrf.mxu2  ;;  %v343_v4 = vpop.f32.mrf.mxu0 }
  0xc5   :  { %v383_v3 = vpop.f32.mrf.mxu3  ;;  %v344_v6 = vadd.f32 %v343_v4, %v170_v58  ;;  %v357_v7 = vpop.f32.mrf.mxu1  ;;  %v370_v9 = vadd.f32 %v369_v1, %v171_v2  ;;  %v2210_v58 = vld [vmem:[#allocation8 + $0x78] sm:$0xff]  ;;  %v2200_v1 = vld [vmem:[#allocation8 + $0x28] sm:$0xff] }
  0xc6   :  { %v2206_v4 = vld [vmem:[#allocation8 + $0x58] sm:$0xff] }
  0xc7   :  { %v358_v8 = vadd.f32 %v357_v7, %v344_v6  ;;  %v384_v14 = vadd.f32 %v383_v3, %v370_v9  ;;  %v2199_v3 = vld [vmem:[#allocation8 + $0x20] sm:$0xff]  ;;  %v2205_v6 = vld [vmem:[#allocation8 + $0x50] sm:$0xff]  ;;  %v2204_v7 = vld [vmem:[#allocation8 + $0x48] sm:$0xff] }
  0xc8   :  { %v2197_v9 = vld [vmem:[#allocation8 + $0x10] sm:$0xff] }
  0xc9   :  { %v390_v11 = vmax.f32 %v358_v8, 0.0  ;;  %v389_v18 = vmax.f32 %v384_v14, 0.0  ;;  %v2203_v8 = vld [vmem:[#allocation8 + $0x40] sm:$0xff] }
  0xcb   :  { %v442_v12 = vpack.c.bf16 %v390_v11, %v388_v10  ;;  %v2196_v10 = vld [vmem:[#allocation8 + $0x8] sm:$0xff]  ;;  %v2195_v11 = vld [vmem:[#allocation8] sm:$0xff] }
  0xcc   :  { %v371_v13 = vpop.f32.mrf.mxu2 }
  0xcd   :  { %v372_v15 = vadd.f32 %v371_v13, %v171_v2  ;;  %v385_v16 = vpop.f32.mrf.mxu3  ;;  %695 = vmatmul.bf16.vlgmr.msrb.gmra.mxu0 %v442_v12  ;;  %737 = vmatmul.bf16.vlgmr.msrb.gmra.mxu3 %v442_v12  ;;  %v2207_v2 = vld [vmem:[#allocation8 + $0x60] sm:$0xff] }
  0xcf   :  { %v386_v17 = vadd.f32 %v385_v16, %v372_v15  ;;  %v849_v15 = vperm.slane %v2851_v55, 2 }
  0xd1   :  { %v391_v19 = vmax.f32 %v386_v17, 0.0 }
  0xd3   :  { %v443_v20 = vpack.c.bf16 %v391_v19, %v389_v18 }
  0xd5   :  { %709 = vmatmul.bf16.vlgmr.msrb.gmra.mxu1 %v443_v20 }
  0xdd   :  { %751 = vmatmul.bf16.vlgmr.msra.gmra.mxu0 %v443_v20 }
  0xe4   :  { %v724_v47 = vpop.f32.mrf.mxu2 }
  0xe5   :  { %765 = vmatmul.bf16.vlgmr.msra.gmra.mxu1 %v2806_v34 }
  0xec   :  { %v726_v48 = vpop.f32.mrf.mxu2 }
 0x14a   :  { %v696_v21 = vpop.f32.mrf.mxu0 }
 0x14b   :  { %v697_v23 = vadd.f32 %v696_v21, %v445_v22 }
 0x150   :  { %v738_v28 = vpop.f32.mrf.mxu3 }
 0x151   :  { %v739_v37 = vadd.f32 %v738_v28, %v446_v33 }
 0x152   :  { %v710_v24 = vpop.f32.mrf.mxu1  ;;  %v698_v26 = vpop.f32.mrf.mxu0 }
 0x153   :  { %v711_v25 = vadd.f32 %v710_v24, %v697_v23  ;;  %v699_v27 = vadd.f32 %v698_v26, %v445_v22 }
 0x155   :  { %v725_v50 = vadd.f32 %v724_v47, %v711_v25 }
 0x158   :  { %v740_v35 = vpop.f32.mrf.mxu3 }
 0x159   :  { %v741_v38 = vadd.f32 %v740_v35, %v446_v33 }
 0x15a   :  { %v712_v29 = vpop.f32.mrf.mxu1  ;;  %v752_v31 = vpop.f32.mrf.mxu0 }
 0x15b   :  { %v713_v30 = vadd.f32 %v712_v29, %v699_v27  ;;  %v753_v39 = vadd.f32 %v752_v31, %v739_v37 }
 0x15d   :  { %v727_v51 = vadd.f32 %v726_v48, %v713_v30 }
 0x162   :  { %v766_v32 = vpop.f32.mrf.mxu1  ;;  %v754_v36 = vpop.f32.mrf.mxu0 }
 0x163   :  { %v755_v34 = vadd.f32 %v754_v36, %v741_v38  ;;  %v767_v41 = vadd.f32 %v766_v32, %v753_v39 }
 0x16a   :  { %v768_v40 = vpop.f32.mrf.mxu1 }
 0x16b   :  { %v769_v42 = vadd.f32 %v768_v40, %v755_v34 }
 0x16d   :  { %v774_v45 = vpack.c.bf16 %v769_v42, %v767_v41 }
 0x16f   :  { %786 = vmatpush.bf16.msra.mxu2 %v774_v45 }
 0x172   :  { %1887 = vmatmul.msk.bf16.vlgmr.msra.gmra.mxu2 %vm775_vm0, %v773_v46 }
 0x173   :  { %946 = vmatpush.bf16.msrb.mxu2 %v2202_v61 }
 0x177   :  { %947 = vmatpush.bf16.msrb.mxu2 %v2201_v63 }
 0x17b   :  { %948 = vmatpush.bf16.msrb.mxu2 %v2200_v1 }
 0x17f   :  { %949 = vmatpush.bf16.msrb.mxu2 %v2199_v3 }
 0x183   :  { %950 = vmatpush.bf16.msrb.mxu2 %v2198_v5 }
 0x187   :  { %951 = vmatpush.bf16.msrb.mxu2 %v2197_v9  ;;  %v2224_v9 = vld [vmem:[#allocation8 + $0xe8] sm:$0xff] }
 0x18b   :  { %952 = vmatpush.bf16.msrb.mxu2 %v2196_v10  ;;  %v2216_v10 = vld [vmem:[#allocation8 + $0xa8] sm:$0xff] }
 0x18f   :  { %953 = vmatpush.bf16.msrb.mxu2 %v2195_v11  ;;  %v2223_v11 = vld [vmem:[#allocation8 + $0xe0] sm:$0xff] }
 0x1f5   :  { %v788_v49 = vpop.f32.mrf.mxu2 }
 0x1f6   :  { %v793_v53 = vadd.f32 %v788_v49, %v725_v50 }
 0x1fd   :  { %v790_v52 = vpop.f32.mrf.mxu2 }
 0x1fe   :  { %v794_v54 = vadd.f32 %v790_v52, %v727_v51 }
 0x200   :  { %v798_v59 = vpack.c.bf16 %v794_v54, %v793_v53 }
 0x202   :  { %809 = vmatpush.bf16.msra.mxu3 %v798_v59 }
 0x205   :  { %1888 = vmatmul.msk.bf16.vlgmr.msra.gmra.mxu3 %vm775_vm0, %v2863_v60 }
 0x206   :  { %960 = vmatpush.bf16.msrb.mxu3 %v2210_v58 }
 0x20a   :  { %961 = vmatpush.bf16.msrb.mxu3 %v2209_v62 }
 0x20e   :  { %962 = vmatpush.bf16.msrb.mxu3 %v2208_v0  ;;  %v1023_v0 = vperm.slane %v2851_v55, 4 }
 0x212   :  { %963 = vmatpush.bf16.msrb.mxu3 %v2207_v2 }
 0x216   :  { %964 = vmatpush.bf16.msrb.mxu3 %v2206_v4  ;;  %v2226_v4 = vld [vmem:[#allocation8 + $0xf8] sm:$0xff] }
 0x21a   :  { %965 = vmatpush.bf16.msrb.mxu3 %v2205_v6  ;;  %v2218_v6 = vld [vmem:[#allocation8 + $0xb8] sm:$0xff] }
 0x21b   :  { %1172 = vmatpush.bf16.msrb.mxu1 %v2218_v6 }
 0x21e   :  { %966 = vmatpush.bf16.msrb.mxu3 %v2204_v7  ;;  %v2225_v7 = vld [vmem:[#allocation8 + $0xf0] sm:$0xff] }
 0x222   :  { %967 = vmatpush.bf16.msrb.mxu3 %v2203_v8  ;;  %v2217_v8 = vld [vmem:[#allocation8 + $0xb0] sm:$0xff] }
 0x223   :  { %1173 = vmatpush.bf16.msrb.mxu1 %v2217_v8 }
 0x225   :  { %968 = vmatmul.bf16.vlgmr.msrb.gmra.mxu3 %v798_v59 }
 0x227   :  { %1174 = vmatpush.bf16.msrb.mxu1 %v2216_v10 }
 0x288   :  { %v811_v12 = vpop.f32.mrf.mxu3 }
 0x290   :  { %v813_v13 = vpop.f32.mrf.mxu3 }
 0x291   :  { %v848_v14 = vpack.c.bf16 %v813_v13, %v811_v12  ;;  %v2215_v12 = vld [vmem:[#allocation8 + $0xa0] sm:$0xff]  ;;  %v2222_v13 = vld [vmem:[#allocation8 + $0xd8] sm:$0xff] }
 0x292   :  { %1175 = vmatpush.bf16.msrb.mxu1 %v2215_v12 }
 0x293   :  { %954 = vmatmul.bf16.vlgmr.msrb.gmra.mxu2 %v848_v14  ;;  %v2214_v14 = vld [vmem:[#allocation8 + $0x98] sm:$0xff] }
 0x296   :  { %1176 = vmatpush.bf16.msrb.mxu1 %v2214_v14  ;;  %v1246_v14 = vperm.slane %v2851_v55, 6 }
 0x2a8   :  { %v969_v16 = vpop.f32.mrf.mxu3 }
 0x2b0   :  { %v971_v24 = vpop.f32.mrf.mxu3 }
 0x316   :  { %v955_v17 = vpop.f32.mrf.mxu2 }
 0x317   :  { %v956_v18 = vadd.f32 %v955_v17, %v849_v15  ;;  %v2219_v17 = vld [vmem:[#allocation8 + $0xc0] sm:$0xff] }
 0x319   :  { %v970_v19 = vadd.f32 %v969_v16, %v956_v18  ;;  %v2220_v16 = vld [vmem:[#allocation8 + $0xc8] sm:$0xff]  ;;  %v2213_v18 = vld [vmem:[#allocation8 + $0x90] sm:$0xff] }
 0x31a   :  { %1177 = vmatpush.bf16.msrb.mxu1 %v2213_v18 }
 0x31b   :  { %v974_v20 = vmax.f32 %v970_v19, 0.0  ;;  %v2212_v19 = vld [vmem:[#allocation8 + $0x88] sm:$0xff] }
 0x31d   :  { %976 = vadd.xlane.f32.xlu0 %v974_v20  ;;  %v982_v21 = vmul.f32 %v974_v20, %v974_v20 }
 0x31e   :  { %v957_v22 = vpop.f32.mrf.mxu2  ;;  %1178 = vmatpush.bf16.msrb.mxu1 %v2212_v19 }
 0x31f   :  { %v958_v23 = vadd.f32 %v957_v22, %v849_v15  ;;  %984 = vadd.xlane.f32.xlu1 %v982_v21  ;;  %v2221_v15 = vld [vmem:[#allocation8 + $0xd0] sm:$0xff] }
 0x321   :  { %v972_v25 = vadd.f32 %v971_v24, %v958_v23  ;;  %v1075_v24 = vperm.slane %v2851_v55, 5 }
 0x323   :  { %v975_v26 = vmax.f32 %v972_v25, 0.0 }
 0x325   :  { %978 = vadd.xlane.f32.xlu0 %v975_v26  ;;  %v983_v27 = vmul.f32 %v975_v26, %v975_v26 }
 0x327   :  { %986 = vadd.xlane.f32.xlu1 %v983_v27 }
 0x390   :  { %v977_v28 = vpop.xlane.xlu0 %976 }
 0x391   :  { %v980_v29 = vmul.f32 0.03125, %v977_v28 }
 0x392   :  { %v985_v30 = vpop.xlane.xlu1 %984 }
 0x393   :  { %v990_v31 = vmul.f32 %v980_v29, %v980_v29  ;;  %v988_v32 = vmul.f32 0.03125, %v985_v30  ;;  %v994_v53 = vsub.f32 %v974_v20, %v980_v29  ;;  %v2211_v20 = vld [vmem:[#allocation8 + $0x80] sm:$0xff] }
 0x394   :  { %1179 = vmatpush.bf16.msrb.mxu1 %v2211_v20  ;;  %v1249_v20 = vperm.slane %v2851_v55, 7  ;;  %v2250_v55 = vld [vmem:[#allocation10 + $0x38] sm:$0xff] }
 0x395   :  { %v992_v33 = vsub.f32 %v988_v32, %v990_v31 }
 0x397   :  { %v996_v35 = vadd.f32 1e-05, %v992_v33 }
 0x398   :  { %v979_v36 = vpop.xlane.xlu0 %978 }
 0x399   :  { %2264 = vrsqrt.f32 %v996_v35  ;;  %v981_v37 = vmul.f32 0.03125, %v979_v36  ;;  %vm1004_vm2 = vweird.f32 %v996_v35 }
 0x39a   :  { %v987_v38 = vpop.xlane.xlu1 %986 }
 0x39b   :  { %v991_v39 = vmul.f32 %v981_v37, %v981_v37  ;;  %v989_v34 = vmul.f32 0.03125, %v987_v38  ;;  %v995_v59 = vsub.f32 %v975_v26, %v981_v37  ;;  %v2242_v38 = vld [vmem:[#allocation8 + $0x178] sm:$0xff] }
 0x39c   :  { %1412 = vmatpush.bf16.msra.mxu1 %v2242_v38  ;;  %v2244_v38 = vld [vmem:[#allocation10 + $0x8] sm:$0xff] }
 0x39d   :  { %v993_v40 = vsub.f32 %v989_v34, %v991_v39  ;;  %v2241_v39 = vld [vmem:[#allocation8 + $0x170] sm:$0xff]  ;;  %v2240_v34 = vld [vmem:[#allocation8 + $0x168] sm:$0xff] }
 0x39f   :  { %v2265_v41 = vpop.eup %2264  ;;  %v997_v42 = vadd.f32 1e-05, %v993_v40  ;;  %v2239_v40 = vld [vmem:[#allocation8 + $0x160] sm:$0xff] }
 0x3a0   :  { %v999_v43 = vmul.f32 %v2265_v41, %v996_v35  ;;  %vm1005_vm1 = vweird.f32 %v2265_v41  ;;  %1413 = vmatpush.bf16.msra.mxu1 %v2241_v39  ;;  %v2243_v39 = vld [vmem:[#allocation10] sm:$0xff] }
 0x3a1   :  { %2266 = vrsqrt.f32 %v997_v42  ;;  %vm1006_vm3 = vmor %vm1004_vm2, %vm1005_vm1  ;;  %vm1014_vm5 = vweird.f32 %v997_v42 }
 0x3a2   :  { %v1000_v44 = vmul.f32 %v2265_v41, %v999_v43 }
 0x3a4   :  { %v1001_v45 = vmul.f32 0.5, %v1000_v44  ;;  %1414 = vmatpush.bf16.msra.mxu1 %v2240_v34  ;;  %v129_v34 = vld [vmem:[#allocation11 + $0x10] sm:$0xff] }
 0x3a6   :  { %v1002_v46 = vsub.f32 1.5, %v1001_v45 }
 0x3a7   :  { %v2267_v47 = vpop.eup %2266 }
 0x3a8   :  { %v1003_v48 = vmul.f32 %v2265_v41, %v1002_v46  ;;  %v1009_v49 = vmul.f32 %v2267_v47, %v997_v42  ;;  %vm1015_vm4 = vweird.f32 %v2267_v47  ;;  %1415 = vmatpush.bf16.msra.mxu1 %v2239_v40  ;;  %v2237_v42 = vld [vmem:[#allocation8 + $0x150] sm:$0xff]  ;;  %v1301_v40 = vperm.slane %v129_v34, 0 }
 0x3a9   :  { %vm1016_vm6 = vmor %vm1014_vm5, %vm1015_vm4 }
 0x3aa   :  { %v1010_v50 = vmul.f32 %v2267_v47, %v1009_v49  ;;  %v1007_v51 = vsel %vm1006_vm3, %v2265_v41, %v1003_v48  ;;  %v2238_v41 = vld [vmem:[#allocation8 + $0x158] sm:$0xff]  ;;  %v2236_v48 = vld [vmem:[#allocation8 + $0x148] sm:$0xff] }
 0x3ab   :  { %v1018_v56 = vmul.f32 %v1007_v51, %v994_v53 }
 0x3ac   :  { %v1011_v52 = vmul.f32 0.5, %v1010_v50  ;;  %1416 = vmatpush.bf16.msra.mxu1 %v2238_v41  ;;  %v2235_v50 = vld [vmem:[#allocation8 + $0x140] sm:$0xff] }
 0x3ad   :  { %v1021_v63 = vmul.f32 %v1020_v57, %v1018_v56 }
 0x3ae   :  { %v1012_v54 = vsub.f32 1.5, %v1011_v52 }
 0x3af   :  { %v1024_v2 = vadd.f32 %v1023_v0, %v1021_v63 }
 0x3b0   :  { %v1013_v58 = vmul.f32 %v2267_v47, %v1012_v54  ;;  %1417 = vmatpush.bf16.msra.mxu1 %v2237_v42 }
 0x3b2   :  { %v1017_v61 = vsel %vm1016_vm6, %v2267_v47, %v1013_v58 }
 0x3b3   :  { %v1019_v62 = vmul.f32 %v1017_v61, %v995_v59  ;;  %v2234_v59 = vld [vmem:[#allocation8 + $0x138] sm:$0xff] }
 0x3b4   :  { %1418 = vmatpush.bf16.msra.mxu1 %v2236_v48  ;;  %1398 = vmatpush.bf16.msra.mxu3 %v2234_v59 }
 0x3b5   :  { %v1022_v1 = vmul.f32 %v1020_v57, %v1019_v62 }
 0x3b7   :  { %v1025_v3 = vadd.f32 %v1023_v0, %v1022_v1  ;;  %v2233_v0 = vld [vmem:[#allocation8 + $0x130] sm:$0xff] }
 0x3b8   :  { %1419 = vmatpush.bf16.msra.mxu1 %v2235_v50  ;;  %1399 = vmatpush.bf16.msra.mxu3 %v2233_v0 }
 0x3b9   :  { %v1026_v5 = vpack.c.bf16 %v1025_v3, %v1024_v2  ;;  %v2232_v3 = vld [vmem:[#allocation8 + $0x128] sm:$0xff] }
 0x3bb   :  { %1034 = vmatpush.bf16.msrb.mxu0 %v1026_v5 }
 0x3bc   :  { %1400 = vmatpush.bf16.msra.mxu3 %v2232_v3 }
 0x3be   :  { %1953 = vmatmul.msk.bf16.vlgmr.msrb.gmra.mxu0 %vm775_vm0, %v2863_v60 }
 0x3bf   :  { %1186 = vmatpush.bf16.msra.mxu0 %v2226_v4 }
 0x3c3   :  { %1187 = vmatpush.bf16.msra.mxu0 %v2225_v7 }
 0x3c7   :  { %1188 = vmatpush.bf16.msra.mxu0 %v2224_v9 }
 0x3cb   :  { %1189 = vmatpush.bf16.msra.mxu0 %v2223_v11 }
 0x3cf   :  { %1190 = vmatpush.bf16.msra.mxu0 %v2222_v13 }
 0x3d3   :  { %1191 = vmatpush.bf16.msra.mxu0 %v2221_v15 }
 0x3d7   :  { %1192 = vmatpush.bf16.msra.mxu0 %v2220_v16 }
 0x3db   :  { %1193 = vmatpush.bf16.msra.mxu0 %v2219_v17 }
 0x3de   :  { %1194 = vmatmul.bf16.vlgmr.msra.gmra.mxu0 %v1026_v5 }
 0x43b   :  { %v1036_v21 = vpop.f32.mrf.mxu0 }
 0x443   :  { %v1038_v22 = vpop.f32.mrf.mxu0 }
 0x444   :  { %v1074_v23 = vpack.c.bf16 %v1038_v22, %v1036_v21 }
 0x446   :  { %1180 = vmatmul.bf16.vlgmr.msrb.gmra.mxu1 %v1074_v23 }
 0x45b   :  { %v1195_v25 = vpop.f32.mrf.mxu0 }
 0x463   :  { %v1197_v33 = vpop.f32.mrf.mxu0 }
 0x4c3   :  { %v1181_v26 = vpop.f32.mrf.mxu1 }
 0x4c4   :  { %v1182_v27 = vadd.f32 %v1181_v26, %v1075_v24  ;;  %v2230_v26 = vld [vmem:[#allocation8 + $0x118] sm:$0xff] }
 0x4c6   :  { %v1196_v28 = vadd.f32 %v1195_v25, %v1182_v27  ;;  %v2231_v25 = vld [vmem:[#allocation8 + $0x120] sm:$0xff]  ;;  %v2229_v27 = vld [vmem:[#allocation8 + $0x110] sm:$0xff] }
 0x4c7   :  { %1401 = vmatpush.bf16.msra.mxu3 %v2231_v25 }
 0x4c8   :  { %v2873_v29 = vmax.f32 %v1196_v28, 0.0  ;;  %v2228_v28 = vld [vmem:[#allocation8 + $0x108] sm:$0xff] }
 0x4ca   :  { %1202 = vadd.xlane.f32.xlu2 %v2873_v29  ;;  %v1208_v30 = vmul.f32 %v2873_v29, %v2873_v29 }
 0x4cb   :  { %v1183_v31 = vpop.f32.mrf.mxu1  ;;  %1402 = vmatpush.bf16.msra.mxu3 %v2230_v26 }
 0x4cc   :  { %v1184_v32 = vadd.f32 %v1183_v31, %v1075_v24  ;;  %1210 = vadd.xlane.f32.xlu0 %v1208_v30  ;;  %v2249_v30 = vld [vmem:[#allocation10 + $0x30] sm:$0xff]  ;;  %v2248_v31 = vld [vmem:[#allocation10 + $0x28] sm:$0xff] }
 0x4ce   :  { %v1198_v35 = vadd.f32 %v1197_v33, %v1184_v32  ;;  %v2247_v32 = vld [vmem:[#allocation10 + $0x20] sm:$0xff] }
 0x4cf   :  { %1403 = vmatpush.bf16.msra.mxu3 %v2229_v27 }
 0x4d0   :  { %v2878_v36 = vmax.f32 %v1198_v35, 0.0 }
 0x4d2   :  { %1204 = vadd.xlane.f32.xlu2 %v2878_v36  ;;  %v1209_v37 = vmul.f32 %v2878_v36, %v2878_v36 }
 0x4d3   :  { %1404 = vmatpush.bf16.msra.mxu3 %v2228_v28 }
 0x4d4   :  { %1212 = vadd.xlane.f32.xlu1 %v1209_v37  ;;  %v2245_v37 = vld [vmem:[#allocation10 + $0x10] sm:$0xff] }
 0x53d   :  { %v1203_v43 = vpop.xlane.xlu2 %1202 }
 0x53e   :  { %v1206_v44 = vmul.f32 0.03125, %v1203_v43 }
 0x53f   :  { %v1211_v45 = vpop.xlane.xlu0 %1210 }
 0x540   :  { %v1216_v46 = vmul.f32 %v1206_v44, %v1206_v44  ;;  %v1214_v47 = vmul.f32 0.03125, %v1211_v45  ;;  %v1220_v11 = vsub.f32 %v2873_v29, %v1206_v44  ;;  %v2227_v29 = vld [vmem:[#allocation8 + $0x100] sm:$0xff] }
 0x541   :  { %1405 = vmatpush.bf16.msra.mxu3 %v2227_v29 }
 0x542   :  { %v1218_v49 = vsub.f32 %v1214_v47, %v1216_v46 }
 0x544   :  { %v1222_v51 = vadd.f32 1e-05, %v1218_v49 }
 0x545   :  { %v1205_v52 = vpop.xlane.xlu2 %1204 }
 0x546   :  { %2268 = vrsqrt.f32 %v1222_v51  ;;  %v1207_v53 = vmul.f32 0.03125, %v1205_v52  ;;  %vm1230_vm8 = vweird.f32 %v1222_v51  ;;  %v1510_v52 = vlaneseq }
 0x547   :  { %v1213_v54 = vpop.xlane.xlu1 %1212 }
 0x548   :  { %v1217_v56 = vmul.f32 %v1207_v53, %v1207_v53  ;;  %v1215_v57 = vmul.f32 0.03125, %v1213_v54  ;;  %v1221_v16 = vsub.f32 %v2878_v36, %v1207_v53  ;;  %v2246_v36 = vld [vmem:[#allocation10 + $0x18] sm:$0xff]  ;;  %v1511_v53 = vand.u32 127, %v1510_v52 }
 0x549   :  { %v1447_v54 = vperm.slane %v129_v34, 1 }
 0x54a   :  { %v1219_v58 = vsub.f32 %v1215_v57, %v1217_v56  ;;  %vm1512_vm13 = vcmp.lt.s32.totalorder %v1511_v53, 4 }
 0x54c   :  { %v2269_v61 = vpop.eup %2268  ;;  %v1223_v62 = vadd.f32 1e-05, %v1219_v58 }
 0x54d   :  { %v1225_v63 = vmul.f32 %v2269_v61, %v1222_v51  ;;  %vm1231_vm7 = vweird.f32 %v2269_v61 }
 0x54e   :  { %2270 = vrsqrt.f32 %v1223_v62  ;;  %vm1232_vm9 = vmor %vm1230_vm8, %vm1231_vm7  ;;  %vm1240_vm11 = vweird.f32 %v1223_v62 }
 0x54f   :  { %v1226_v1 = vmul.f32 %v2269_v61, %v1225_v63 }
 0x551   :  { %v1227_v2 = vmul.f32 0.5, %v1226_v1 }
 0x553   :  { %v1228_v4 = vsub.f32 1.5, %v1227_v2 }
 0x554   :  { %v2271_v5 = vpop.eup %2270 }
 0x555   :  { %v1229_v6 = vmul.f32 %v2269_v61, %v1228_v4  ;;  %v1235_v7 = vmul.f32 %v2271_v5, %v1223_v62  ;;  %vm1241_vm10 = vweird.f32 %v2271_v5 }
 0x556   :  { %vm1242_vm12 = vmor %vm1240_vm11, %vm1241_vm10 }
 0x557   :  { %v1236_v8 = vmul.f32 %v2271_v5, %v1235_v7  ;;  %v1233_v9 = vsel %vm1232_vm9, %v2269_v61, %v1229_v6 }
 0x558   :  { %v1244_v13 = vmul.f32 %v1233_v9, %v1220_v11 }
 0x559   :  { %v1237_v10 = vmul.f32 0.5, %v1236_v8 }
 0x55a   :  { %v1247_v19 = vmul.f32 %v1246_v14, %v1244_v13 }
 0x55b   :  { %v1238_v12 = vsub.f32 1.5, %v1237_v10 }
 0x55c   :  { %v1250_v22 = vadd.f32 %v1249_v20, %v1247_v19 }
 0x55d   :  { %v1239_v15 = vmul.f32 %v2271_v5, %v1238_v12 }
 0x55f   :  { %v1243_v17 = vsel %vm1242_vm12, %v2271_v5, %v1239_v15 }
 0x560   :  { %v1245_v18 = vmul.f32 %v1243_v17, %v1221_v16 }
 0x562   :  { %v1248_v21 = vmul.f32 %v1246_v14, %v1245_v18 }
 0x564   :  { %v1251_v23 = vadd.f32 %v1249_v20, %v1248_v21 }
 0x566   :  { %v1252_v24 = vpack.c.bf16 %v1251_v23, %v1250_v22 }
 0x568   :  { %1260 = vmatpush.bf16.msra.mxu2 %v1252_v24  ;;  %1420 = vmatmul.bf16.vlgmr.msra.gmra.mxu1 %v1252_v24 }
 0x56b   :  { %2018 = vmatmul.msk.bf16.vlgmr.msra.gmra.mxu2 %vm775_vm0, %v2863_v60 }
 0x56c   :  { %1496 = vmatpush.bf16.msrb.mxu2 %v2250_v55 }
 0x570   :  { %1497 = vmatpush.bf16.msrb.mxu2 %v2249_v30 }
 0x574   :  { %1498 = vmatpush.bf16.msrb.mxu2 %v2248_v31 }
 0x578   :  { %1499 = vmatpush.bf16.msrb.mxu2 %v2247_v32 }
 0x57c   :  { %1500 = vmatpush.bf16.msrb.mxu2 %v2246_v36 }
 0x580   :  { %1501 = vmatpush.bf16.msrb.mxu2 %v2245_v37 }
 0x584   :  { %1502 = vmatpush.bf16.msrb.mxu2 %v2244_v38 }
 0x588   :  { %1503 = vmatpush.bf16.msrb.mxu2 %v2243_v39 }
 0x5e5   :  { %v1421_v41 = vpop.f32.mrf.mxu1 }
 0x5ed   :  { %v1423_v47 = vpop.f32.mrf.mxu1 }
 0x5ee   :  { %v1262_v33 = vpop.f32.mrf.mxu2 }
 0x5f6   :  { %v1264_v60 = vpop.f32.mrf.mxu2 }
 0x5f7   :  { %v1300_v35 = vpack.c.bf16 %v1264_v60, %v1262_v33 }
 0x5f9   :  { %1406 = vmatmul.bf16.vlgmr.msra.gmra.mxu3 %v1300_v35 }
 0x67c   :  { %v1407_v42 = vpop.f32.mrf.mxu3 }
 0x67d   :  { %v1408_v43 = vadd.f32 %v1407_v42, %v1301_v40 }
 0x67f   :  { %v1422_v44 = vadd.f32 %v1421_v41, %v1408_v43 }
 0x681   :  { %1428 = vst [vmem:[#allocation13] sm:$0xff] %v1422_v44  ;;  %v1426_v49 = vmax.f32 %v1422_v44, 0.0 }
 0x684   :  { %v1409_v45 = vpop.f32.mrf.mxu3 }
 0x685   :  { %v1410_v46 = vadd.f32 %v1409_v45, %v1301_v40 }
 0x687   :  { %v1424_v48 = vadd.f32 %v1423_v47, %v1410_v46 }
 0x689   :  { %v1427_v50 = vmax.f32 %v1424_v48, 0.0  ;;  %1429 = vst [vmem:[#allocation13 + $0x8] sm:$0xff] %v1424_v48 }
 0x68a   :  { %1553 = dma.vmem_to_hbm [thread:$0]  %s1546_s2, 256, %s1548_s24, [#allocation4], %s2459_s17, %s2459_s17, %s2460_s18  }
 0x68b   :  { %v1446_v51 = vpack.c.bf16 %v1427_v50, %v1426_v49 }
 0x68d   :  { %1504 = vmatmul.bf16.vlgmr.msrb.gmra.mxu2 %v1446_v51 }
 0x710   :  { %v1505_v56 = vpop.f32.mrf.mxu2 }
 0x711   :  { %v1506_v57 = vadd.f32 %v1505_v56, %v1447_v54 }
 0x713   :  { %v1515_v58 = vsel %vm1512_vm13, %v1506_v57, -1e+30 }
 0x714   :  { %1517 = vmax.xlane.f32.xlu2 %v1515_v58 }
 0x718   :  { %v1507_v59 = vpop.f32.mrf.mxu2 }
 0x719   :  { %v1508_v61 = vadd.f32 %v1507_v59, %v1447_v54 }
 0x71b   :  { %v1516_v62 = vsel %vm1512_vm13, %v1508_v61, -1e+30 }
 0x71c   :  { %1519 = vmax.xlane.f32.xlu0 %v1516_v62 }
 0x787   :  { %v1518_v63 = vpop.xlane.xlu2 %1517 }
 0x788   :  { %v1521_v0 = vsub.f32 %v1515_v58, %v1518_v63 }
 0x78a   :  { %v1523_v1 = vmul.f32 1.442695, %v1521_v0 }
 0x78c   :  { %2272 = vpow2.f32 %v1523_v1 }
 0x78f   :  { %v1520_v2 = vpop.xlane.xlu0 %1519 }
 0x790   :  { %v1522_v3 = vsub.f32 %v1516_v62, %v1520_v2 }
 0x792   :  { %v2273_v4 = vpop.eup %2272  ;;  %v1525_v5 = vmul.f32 1.442695, %v1522_v3 }
 0x793   :  { %1527 = vadd.xlane.f32.xlu1 %v2273_v4 }
 0x794   :  { %2274 = vpow2.f32 %v1525_v5 }
 0x79a   :  { %v2275_v6 = vpop.eup %2274 }
 0x79b   :  { %1529 = vadd.xlane.f32.xlu2 %v2275_v6 }
 0x806   :  { %v1528_v7 = vpop.xlane.xlu1 %1527 }
 0x807   :  { %2276 = vlog2.f32 %v1528_v7 }
 0x80d   :  { %v2277_v8 = vpop.eup %2276 }
 0x80e   :  { %v1532_v9 = vmul.f32 0.6931472, %v2277_v8  ;;  %v1530_v10 = vpop.xlane.xlu2 %1529 }
 0x80f   :  { %2278 = vlog2.f32 %v1530_v10 }
 0x810   :  { %v1535_v11 = vadd.f32 %v1532_v9, %v1518_v63 }
 0x812   :  { %v1537_v12 = vsub.f32 %v1515_v58, %v1535_v11 }
 0x814   :  { %1539 = vst [vmem:[%s2910_s9] sm:$0xff] %v1537_v12 }
 0x815   :  { %v2279_v13 = vpop.eup %2278 }
 0x816   :  { %v1534_v14 = vmul.f32 0.6931472, %v2279_v13 }
 0x818   :  { %v1536_v15 = vadd.f32 %v1534_v14, %v1520_v2 }
 0x81a   :  { %v1538_v16 = vsub.f32 %v1516_v62, %v1536_v15 }
 0x81c   :  { %1540 = vst [vmem:[%s2910_s9 + $0x8] sm:$0xff] %v1538_v16 }
 0x81d   :  { %2456 = dma.done.wait [#allocation4], 256  }
 0x81e   :  { %2457 = vsyncadd [#allocation4], 4294967040 }
 0x81f   :  { %1562 = vsyncpa [#allocation3], 1 }
 0x820   :  { %1563 = vsyncpa [#allocation6], 1 }
 0x821   :  { %1564 = vsyncpa [#allocation9], 1 }
 0x822   :  { %1565 = vsyncpa [#allocation12], 1 }
 0x823   :  { %1566 = vsyncpa [#allocation4], 1 }

</bundles_post_ra>
